<compile_context>
chip_gen: v6e
topology: v6e:2x2x1
jax: 0.10.0
libtpu: 0.0.40
codegen_flags: <defaults>
</compile_context>

<pallas_src>
import jax
import jax.numpy as jnp
from jax.experimental import pallas as pl
from jax.experimental.pallas import tpu as pltpu


def critic_kernel(s_ref, a_ref, w1_ref, b1_ref, w2a_ref, b2a_ref,
                  w2b_ref, w4_ref, b4_ref, q_ref):
    bf = jnp.bfloat16
    s = s_ref[...]          # (TB, S) f32
    a = a_ref[...]          # (TB, A) f32

    # layer1a + ReLU  (bf16 MXU operands, f32 accumulation & f32 VPU epilogue)
    ls = jnp.dot(s.astype(bf), w1_ref[...], preferred_element_type=jnp.float32)
    ls = jnp.maximum(ls + b1_ref[...], 0.0)                        # (TB, 800)

    # state / action branches (torch.mm -> no per-branch bias).
    # TODO(synk): the K=action_size matmul pads K to 128 on the MXU; fusing it
    # with the state branch would need a lane-boundary concat (800 is not a
    # multiple of 128), so the two dots are kept separate.
    out_s = jnp.dot(ls.astype(bf), w2a_ref[...],
                    preferred_element_type=jnp.float32)            # (TB, 600)
    out_a = jnp.dot(a.astype(bf), w2b_ref[...],
                    preferred_element_type=jnp.float32)            # (TB, 600)
    out = jnp.maximum(out_s + out_a + b2a_ref[...], 0.0)           # (TB, 600)

    # layer4 — lane-dense: (600, 128) zero-padded weight, real Q1 in column 0.
    q_ref[...] = jnp.dot(out.astype(bf), w4_ref[...],
                         preferred_element_type=jnp.float32) + b4_ref[...]


def _round_up(x, m):
    return (x + m - 1) // m * m


def critic_forward(s, a, params, *, tb=256):
    """s: (B, state_size), a: (B, action_size). Returns Q1: (B, 1) float32."""
    (w1_t, b1, w2a_t, b2a, w2b_t, w4_t, b4) = params

    B = s.shape[0]
    # glue: flatten (self.flatten in the reference)
    s = s.reshape(B, -1).astype(jnp.float32)
    a = a.reshape(B, -1).astype(jnp.float32)
    S, A = s.shape[1], a.shape[1]
    H1, H2 = w1_t.shape[1], w2a_t.shape[1]
    QL = 128  # lane-dense output width (real Q in column 0)

    # Batch tiling: TB sized so (double-buffered tiles + resident bf16 weights
    # + f32 activations) stays far below v7x's 64 MiB VMEM / 32 MiB scoped.
    TB = min(tb, _round_up(B, 8))
    B_pad = _round_up(B, TB)
    if B_pad != B:
        s = jnp.pad(s, ((0, B_pad - B), (0, 0)))
        a = jnp.pad(a, ((0, B_pad - B), (0, 0)))

    # Pad the (H2, 1) final layer out to 128 lanes -> unmasked vector stores.
    w4_pad = jnp.pad(w4_t, ((0, 0), (0, QL - w4_t.shape[1])))
    b4_pad = jnp.pad(b4, ((0, 0), (0, QL - b4.shape[1])))

    # bf16 weights (halve HBM/VMEM traffic); biases stay f32 for the VPU.
    bf = jnp.bfloat16
    w1_b = w1_t.astype(bf)
    w2a_b = w2a_t.astype(bf)
    w2b_b = w2b_t.astype(bf)
    w4_b = w4_pad.astype(bf)

    grid = (B_pad // TB,)

    def batch_spec(cols):
        return pl.BlockSpec((TB, cols), lambda i: (i, 0))

    def resident_spec(shape):
        # Constant index_map -> block never changes -> stays VMEM-resident.
        return pl.BlockSpec(shape, lambda i: (0, 0))

    weight_bytes = (w1_b.size + w2a_b.size + w2b_b.size + w4_b.size) * 2 \
                   + (b1.size + b2a.size + b4_pad.size) * 4
    act_bytes = B_pad * (S + A + QL) * 4
    flops = 2 * B_pad * (S * H1 + H1 * H2 + A * H2 + H2 * QL)

    q_full = pl.pallas_call(
        critic_kernel,
        out_shape=jax.ShapeDtypeStruct((B_pad, QL), jnp.float32),
        grid=grid,
        in_specs=[
            batch_spec(S),                   # s
            batch_spec(A),                   # a
            resident_spec(w1_b.shape),       # W1 (S, 800) bf16
            resident_spec(b1.shape),         # b1 (1, 800) f32
            resident_spec(w2a_b.shape),      # W2a (800, 600) bf16
            resident_spec(b2a.shape),        # b2a (1, 600) f32
            resident_spec(w2b_b.shape),      # W2b (A, 600) bf16
            resident_spec(w4_b.shape),       # W4 (600, 128) bf16 (padded)
            resident_spec(b4_pad.shape),     # b4 (1, 128) f32 (padded)
        ],
        out_specs=pl.BlockSpec((TB, QL), lambda i: (i, 0)),
        compiler_params=pltpu.CompilerParams(
            dimension_semantics=("parallel",),   # shards batch tiles across TCs (v7x)
            vmem_limit_bytes=32 * 1024 * 1024,
        ),
        cost_estimate=pl.CostEstimate(
            flops=flops,
            transcendentals=0,
            bytes_accessed=weight_bytes + act_bytes,
        ),
    )(s, a, w1_b, b1, w2a_b, b2a, w2b_b, w4_b, b4_pad)

    return q_full[:B, :1]


def init_params(key, state_size, action_size):
    """PyTorch-style uniform(-1/sqrt(fan_in), 1/sqrt(fan_in)) init.
    Weights are returned already transposed to (in, out), float32."""
    def linear(key, fan_in, fan_out):
        kw, kb = jax.random.split(key)
        bound = 1.0 / jnp.sqrt(fan_in)
        w = jax.random.uniform(kw, (fan_in, fan_out), jnp.float32, -bound, bound)
        b = jax.random.uniform(kb, (1, fan_out), jnp.float32, -bound, bound)
        return w, b

    k1, k2a, k2b, k4 = jax.random.split(key, 4)
    w1_t, b1 = linear(k1, state_size, 800)
    w2a_t, b2a = linear(k2a, 800, 600)
    w2b_t, _b2b = linear(k2b, action_size, 600)   # layer2b bias unused in forward
    w4_t, b4 = linear(k4, 600, 1)
    return (w1_t, b1, w2a_t, b2a, w2b_t, w4_t, b4)


def critic_ref(s, a, params):
    """Pure-JAX reference mirroring the kernel's bf16-weight / f32-accum path."""
    (w1_t, b1, w2a_t, b2a, w2b_t, w4_t, b4) = params
    B = s.shape[0]
    s = s.reshape(B, -1).astype(jnp.float32)
    a = a.reshape(B, -1).astype(jnp.float32)

    def mm(x, w):
        return jnp.dot(x.astype(jnp.bfloat16), w.astype(jnp.bfloat16),
                       preferred_element_type=jnp.float32)

    ls = jnp.maximum(mm(s, w1_t) + b1, 0.0)
    out = jnp.maximum(mm(ls, w2a_t) + mm(a, w2b_t) + b2a, 0.0)
    return mm(out, w4_t) + b4


if __name__ == "__main__":
    B, STATE_SIZE, ACTION_SIZE = 2, 24, 6

    key = jax.random.PRNGKey(0)
    kp, ks, ka = jax.random.split(key, 3)

    params = init_params(kp, STATE_SIZE, ACTION_SIZE)
    s = jax.random.normal(ks, (B, STATE_SIZE), jnp.float32)
    a = jax.random.normal(ka, (B, ACTION_SIZE), jnp.float32)

    q = critic_forward(s, a, params)
    q = jax.block_until_ready(q)

    q_ref = critic_ref(s, a, params)
    assert q.shape == (B, 1), q.shape
    assert jnp.allclose(q, q_ref, atol=1e-2, rtol=1e-2), (q, q_ref)

    print("KERNEL_OK")
</pallas_src>

<mosaic_0001>
module attributes {stable_mosaic.version = 11 : i64} {
  func.func @critic_kernel(%arg0: i32, %arg1: memref<8x24xf32, #tpu.memory_space<vmem>>, %arg2: memref<8x6xf32, #tpu.memory_space<vmem>>, %arg3: memref<24x800xbf16, #tpu.memory_space<vmem>>, %arg4: memref<1x800xf32, #tpu.memory_space<vmem>>, %arg5: memref<800x600xbf16, #tpu.memory_space<vmem>>, %arg6: memref<1x600xf32, #tpu.memory_space<vmem>>, %arg7: memref<6x600xbf16, #tpu.memory_space<vmem>>, %arg8: memref<600x128xbf16, #tpu.memory_space<vmem>>, %arg9: memref<1x128xf32, #tpu.memory_space<vmem>>, %arg10: memref<8x128xf32, #tpu.memory_space<vmem>>) attributes {dimension_semantics = [#tpu.dimension_semantics<parallel>], iteration_bounds = array<i64: 1>, scalar_prefetch = 0 : i64, scratch_operands = 0 : i64, tpu.core_type = #tpu.core_type<tc>, window_params = [{transform_indices = @transform_0, window_bounds = array<i64: 8, 24>}, {transform_indices = @transform_1, window_bounds = array<i64: 8, 6>}, {pipeline_mode = #tpu.pipeline_mode<synchronous>, transform_indices = @transform_2, window_bounds = array<i64: 24, 800>}, {pipeline_mode = #tpu.pipeline_mode<synchronous>, transform_indices = @transform_3, window_bounds = array<i64: 1, 800>}, {pipeline_mode = #tpu.pipeline_mode<synchronous>, transform_indices = @transform_4, window_bounds = array<i64: 800, 600>}, {pipeline_mode = #tpu.pipeline_mode<synchronous>, transform_indices = @transform_5, window_bounds = array<i64: 1, 600>}, {pipeline_mode = #tpu.pipeline_mode<synchronous>, transform_indices = @transform_6, window_bounds = array<i64: 6, 600>}, {pipeline_mode = #tpu.pipeline_mode<synchronous>, transform_indices = @transform_7, window_bounds = array<i64: 600, 128>}, {pipeline_mode = #tpu.pipeline_mode<synchronous>, transform_indices = @transform_8, window_bounds = array<i64: 1, 128>}, {transform_indices = @transform_9, window_bounds = array<i64: 8, 128>}]} {
    %c0 = arith.constant 0 : index
    %c0_0 = arith.constant 0 : index
    %0 = vector.load %arg1[%c0, %c0_0] : memref<8x24xf32, #tpu.memory_space<vmem>>, vector<8x24xf32>
    %c0_1 = arith.constant 0 : index
    %c0_2 = arith.constant 0 : index
    %1 = vector.load %arg2[%c0_1, %c0_2] : memref<8x6xf32, #tpu.memory_space<vmem>>, vector<8x6xf32>
    %2 = arith.truncf %0 : vector<8x24xf32> to vector<8x24xbf16>
    %c0_3 = arith.constant 0 : index
    %c0_4 = arith.constant 0 : index
    %3 = vector.load %arg3[%c0_3, %c0_4] : memref<24x800xbf16, #tpu.memory_space<vmem>>, vector<24x800xbf16>
    %cst = arith.constant dense<0.000000e+00> : vector<8x800xf32>
    %4 = tpu.matmul %2, %3, %cst {dimension_numbers = #tpu.dot_dimension_numbers<[1], [0], [0], [1], [0, 0, 1, 1], [], []>} : vector<8x24xbf16>, vector<24x800xbf16>, vector<8x800xf32> -> vector<8x800xf32>
    %c0_5 = arith.constant 0 : index
    %c0_6 = arith.constant 0 : index
    %5 = vector.load %arg4[%c0_5, %c0_6] : memref<1x800xf32, #tpu.memory_space<vmem>>, vector<1x800xf32>
    %6 = vector.broadcast %5 : vector<1x800xf32> to vector<8x800xf32>
    %7 = arith.addf %4, %6 : vector<8x800xf32>
    %cst_7 = arith.constant 0.000000e+00 : f32
    %8 = vector.broadcast %cst_7 : f32 to vector<8x800xf32>
    %9 = arith.maximumf %7, %8 : vector<8x800xf32>
    %10 = arith.truncf %9 : vector<8x800xf32> to vector<8x800xbf16>
    %c0_8 = arith.constant 0 : index
    %c0_9 = arith.constant 0 : index
    %11 = vector.load %arg5[%c0_8, %c0_9] : memref<800x600xbf16, #tpu.memory_space<vmem>>, vector<800x600xbf16>
    %cst_10 = arith.constant dense<0.000000e+00> : vector<8x600xf32>
    %12 = tpu.matmul %10, %11, %cst_10 {dimension_numbers = #tpu.dot_dimension_numbers<[1], [0], [0], [1], [0, 0, 1, 1], [], []>} : vector<8x800xbf16>, vector<800x600xbf16>, vector<8x600xf32> -> vector<8x600xf32>
    %13 = arith.truncf %1 : vector<8x6xf32> to vector<8x6xbf16>
    %c0_11 = arith.constant 0 : index
    %c0_12 = arith.constant 0 : index
    %14 = vector.load %arg7[%c0_11, %c0_12] : memref<6x600xbf16, #tpu.memory_space<vmem>>, vector<6x600xbf16>
    %cst_13 = arith.constant dense<0.000000e+00> : vector<8x600xf32>
    %15 = tpu.matmul %13, %14, %cst_13 {dimension_numbers = #tpu.dot_dimension_numbers<[1], [0], [0], [1], [0, 0, 1, 1], [], []>} : vector<8x6xbf16>, vector<6x600xbf16>, vector<8x600xf32> -> vector<8x600xf32>
    %16 = arith.addf %12, %15 : vector<8x600xf32>
    %c0_14 = arith.constant 0 : index
    %c0_15 = arith.constant 0 : index
    %17 = vector.load %arg6[%c0_14, %c0_15] : memref<1x600xf32, #tpu.memory_space<vmem>>, vector<1x600xf32>
    %18 = vector.broadcast %17 : vector<1x600xf32> to vector<8x600xf32>
    %19 = arith.addf %16, %18 : vector<8x600xf32>
    %cst_16 = arith.constant 0.000000e+00 : f32
    %20 = vector.broadcast %cst_16 : f32 to vector<8x600xf32>
    %21 = arith.maximumf %19, %20 : vector<8x600xf32>
    %22 = arith.truncf %21 : vector<8x600xf32> to vector<8x600xbf16>
    %c0_17 = arith.constant 0 : index
    %c0_18 = arith.constant 0 : index
    %23 = vector.load %arg8[%c0_17, %c0_18] : memref<600x128xbf16, #tpu.memory_space<vmem>>, vector<600x128xbf16>
    %cst_19 = arith.constant dense<0.000000e+00> : vector<8x128xf32>
    %24 = tpu.matmul %22, %23, %cst_19 {dimension_numbers = #tpu.dot_dimension_numbers<[1], [0], [0], [1], [0, 0, 1, 1], [], []>} : vector<8x600xbf16>, vector<600x128xbf16>, vector<8x128xf32> -> vector<8x128xf32>
    %c0_20 = arith.constant 0 : index
    %c0_21 = arith.constant 0 : index
    %25 = vector.load %arg9[%c0_20, %c0_21] : memref<1x128xf32, #tpu.memory_space<vmem>>, vector<1x128xf32>
    %26 = vector.broadcast %25 : vector<1x128xf32> to vector<8x128xf32>
    %27 = arith.addf %24, %26 : vector<8x128xf32>
    %c0_22 = arith.constant 0 : index
    %c0_23 = arith.constant 0 : index
    %28 = vector.load %arg10[%c0_22, %c0_23] : memref<8x128xf32, #tpu.memory_space<vmem>>, vector<8x128xf32>
    tpu.vector_store %arg10[%c0_22, %c0_23], %27 {strides = array<i32>} : memref<8x128xf32, #tpu.memory_space<vmem>>, vector<8x128xf32>,
    return
  }
  func.func @transform_0(%arg0: i32) -> (i32, i32) {
    %c0_i32 = arith.constant 0 : i32
    %c0_i32_0 = arith.constant 0 : i32
    return %arg0, %c0_i32 : i32, i32
  }
  func.func @transform_1(%arg0: i32) -> (i32, i32) {
    %c0_i32 = arith.constant 0 : i32
    %c0_i32_0 = arith.constant 0 : i32
    return %arg0, %c0_i32 : i32, i32
  }
  func.func @transform_2(%arg0: i32) -> (i32, i32) {
    %c0_i32 = arith.constant 0 : i32
    %c0_i32_0 = arith.constant 0 : i32
    %c0_i32_1 = arith.constant 0 : i32
    return %c0_i32, %c0_i32_0 : i32, i32
  }
  func.func @transform_3(%arg0: i32) -> (i32, i32) {
    %c0_i32 = arith.constant 0 : i32
    %c0_i32_0 = arith.constant 0 : i32
    %c0_i32_1 = arith.constant 0 : i32
    return %c0_i32, %c0_i32_0 : i32, i32
  }
  func.func @transform_4(%arg0: i32) -> (i32, i32) {
    %c0_i32 = arith.constant 0 : i32
    %c0_i32_0 = arith.constant 0 : i32
    %c0_i32_1 = arith.constant 0 : i32
    return %c0_i32, %c0_i32_0 : i32, i32
  }
  func.func @transform_5(%arg0: i32) -> (i32, i32) {
    %c0_i32 = arith.constant 0 : i32
    %c0_i32_0 = arith.constant 0 : i32
    %c0_i32_1 = arith.constant 0 : i32
    return %c0_i32, %c0_i32_0 : i32, i32
  }
  func.func @transform_6(%arg0: i32) -> (i32, i32) {
    %c0_i32 = arith.constant 0 : i32
    %c0_i32_0 = arith.constant 0 : i32
    %c0_i32_1 = arith.constant 0 : i32
    return %c0_i32, %c0_i32_0 : i32, i32
  }
  func.func @transform_7(%arg0: i32) -> (i32, i32) {
    %c0_i32 = arith.constant 0 : i32
    %c0_i32_0 = arith.constant 0 : i32
    %c0_i32_1 = arith.constant 0 : i32
    return %c0_i32, %c0_i32_0 : i32, i32
  }
  func.func @transform_8(%arg0: i32) -> (i32, i32) {
    %c0_i32 = arith.constant 0 : i32
    %c0_i32_0 = arith.constant 0 : i32
    %c0_i32_1 = arith.constant 0 : i32
    return %c0_i32, %c0_i32_0 : i32, i32
  }
  func.func @transform_9(%arg0: i32) -> (i32, i32) {
    %c0_i32 = arith.constant 0 : i32
    %c0_i32_0 = arith.constant 0 : i32
    return %arg0, %c0_i32 : i32, i32
  }
}

</mosaic_0001>

<bundles_post_ra>
// kernel: tpu_custom_call.1
= control target key start
LH: loop header
LB: loop body
LE: loop exit
PB: predicated region body
PF: predicated region fallthrough
CT: control target
= control target key end

     0   :  { %14 = vsyncpa [#allocation3], 0  ;;  %s4507_s0 = inlined_call_operand.hbm [shape: f32[8,24], index: 0, kind: input, shape index: {}]   ;;  %s4508_s1 = inlined_call_operand.hbm [shape: f32[8,6], index: 1, kind: input, shape index: {}]   ;;  %s4509_s2 = inlined_call_operand.hbm [shape: bf16[24,800], index: 2, kind: input, shape index: {}]   ;;  %s4510_s3 = inlined_call_operand.hbm [shape: f32[1,800], index: 3, kind: input, shape index: {}]   ;;  %s4511_s4 = inlined_call_operand.hbm [shape: bf16[800,600], index: 4, kind: input, shape index: {}]   ;;  %s4512_s5 = inlined_call_operand.vmem [shape: f32[1,600], index: 5, kind: input, shape index: {}]   ;;  %s4513_s6 = inlined_call_operand.hbm [shape: bf16[6,600], index: 6, kind: input, shape index: {}]   ;;  %s4514_s7 = inlined_call_operand.hbm [shape: bf16[600,128], index: 7, kind: input, shape index: {}]   ;;  %s4515_s8 = inlined_call_operand.vmem [shape: f32[1,128], index: 8, kind: input, shape index: {}]   ;;  %s4516_s9 = inlined_call_operand.hbm [shape: f32[8,128], index: 9, kind: output, shape index: {}]  }
   0x1   :  { %15 = vsyncpa [#allocation6], 0 }
   0x2   :  { %16 = vsyncpa [#allocation9], 0 }
   0x3   :  { %17 = vsyncpa [#allocation12], 0 }
   0x4   :  { %18 = vsyncpa [#allocation4], 0  ;;  %s4260_s30 = smov [#allocation5]   ;;  %s4261_s11 = smov [#allocation8]  }
   0x5   :  { %s35_s10 = sshll.u32 %s4260_s30, 4  ;;  %s57_s12 = sshll.u32 %s4261_s11, 4  ;;  %s36_s10 = int_to_ptr.vmem [resolvable:$true] %s35_s10  ;;  %s58_s12 = int_to_ptr.vmem [resolvable:$true] %s57_s12 }
   0x6   :  { %s4098_s13 = scalar_lea.vmem %s36_s10, 128  ;;  %p4103_p1 = scmp.lt.s32.totalorder %s36_s10, %s36_s10 }
   0x7   :  { %p4099_p0 = scmp.ne.s32.totalorder %s36_s10, %s4098_s13  ;;  %p4104_p2 = scmp.lt.s32.totalorder %s4098_s13, %s4098_s13 }
   0x9   :  { %p4105_p3 = por %p4104_p2, %p4103_p1 }
   0xb   :  { %p4106_p4 = pnand %p4105_p3, %p4099_p0 }
   0xd   :  { %4109 = shalt.err (!%p4106_p4)
}
   0xe   :  { %38 = dma.hbm_to_vmem [thread:$0]  %s4508_s1, 128, %s36_s10, [#allocation6]  }
   0xf   :  { %s4118_s16 = scalar_lea.vmem %s58_s12, 112  ;;  %s4122_s17 = scalar_lea.vmem %s58_s12, 128 }
  0x10   :  { %p4119_p5 = scmp.ne.s32.totalorder %s58_s12, %s4118_s16  ;;  %p4123_p6 = scmp.lt.s32.totalorder %s58_s12, %s58_s12 }
  0x11   :  { %p4124_p7 = scmp.lt.s32.totalorder %s4122_s17, %s4118_s16 }
  0x13   :  { %p4125_p8 = por %p4124_p7, %p4123_p6 }
  0x15   :  { %p4126_p9 = pnand %p4125_p8, %p4119_p5 }
  0x17   :  { %4129 = shalt.err (!%p4126_p9)
}
  0x18   :  { %60 = dma.hbm_to_vmem [thread:$0]  %s4510_s3, 112, %s58_s12, [#allocation9]  }
  0x19   :  { %s4262_s20 = smov [#allocation11]   ;;  %s4263_s22 = smov [#allocation2]  }
  0x1a   :  { %s81_s21 = sshll.u32 %s4262_s20, 4  ;;  %s25_s23 = sshll.u32 %s4263_s22, 4  ;;  %s82_s21 = int_to_ptr.vmem [resolvable:$true] %s81_s21  ;;  %s26_s23 = int_to_ptr.vmem [resolvable:$true] %s25_s23 }
  0x1b   :  { %s4138_s24 = scalar_lea.vmem %s82_s21, 320  ;;  %p4143_p11 = scmp.lt.s32.totalorder %s82_s21, %s82_s21 }
  0x1c   :  { %p4139_p10 = scmp.ne.s32.totalorder %s82_s21, %s4138_s24  ;;  %p4144_p12 = scmp.lt.s32.totalorder %s4138_s24, %s4138_s24 }
  0x1e   :  { %p4145_p13 = por %p4144_p12, %p4143_p11 }
  0x20   :  { %p4146_p0 = pnand %p4145_p13, %p4139_p10 }
  0x22   :  { %4149 = shalt.err (!%p4146_p0)
}
  0x23   :  { %84 = dma.hbm_to_vmem [thread:$0]  %s4513_s6, 320, %s82_s21, [#allocation12]  }
  0x24   :  { %s4158_s26 = scalar_lea.vmem %s26_s23, 128  ;;  %p4163_p2 = scmp.lt.s32.totalorder %s26_s23, %s26_s23 }
  0x25   :  { %p4159_p1 = scmp.ne.s32.totalorder %s26_s23, %s4158_s26  ;;  %p4164_p3 = scmp.lt.s32.totalorder %s4158_s26, %s4158_s26 }
  0x27   :  { %p4165_p4 = por %p4164_p3, %p4163_p2 }
  0x29   :  { %p4166_p5 = pnand %p4165_p4, %p4159_p1 }
  0x2b   :  { %4169 = shalt.err (!%p4166_p5)
}
  0x2c   :  { %28 = dma.hbm_to_vmem [thread:$0]  %s4507_s0, 128, %s26_s23, [#allocation3]  }
  0x2d   :  { %s4264_s28 = smov [#allocation7]  }
  0x2e   :  { %s44_s29 = sshll.u32 %s4264_s28, 4  ;;  %s45_s29 = int_to_ptr.vmem [resolvable:$true] %s44_s29 }
  0x2f   :  { %s4178_s30 = scalar_lea.vmem %s45_s29, 1344  ;;  %p4183_p7 = scmp.lt.s32.totalorder %s45_s29, %s45_s29 }
  0x30   :  { %p4179_p6 = scmp.ne.s32.totalorder %s45_s29, %s4178_s30  ;;  %p4184_p8 = scmp.lt.s32.totalorder %s4178_s30, %s4178_s30 }
  0x32   :  { %p4185_p9 = por %p4184_p8, %p4183_p7 }
  0x34   :  { %p4186_p10 = pnand %p4185_p9, %p4179_p6 }
  0x36   :  { %4189 = shalt.err (!%p4186_p10)
}
  0x37   :  { %s4265_s6 = smov 448   ;;  %s4266_s10 = smov 28  }
  0x38   :  { %50 = dma.hbm_to_vmem [thread:$0]  %s4509_s2, 1344, %s45_s29, [#allocation6], %s4265_s6, %s4265_s6, %s4266_s10  }
  0x39   :  { %s4267_s13 = smov [#allocation10]  }
  0x3a   :  { %s66_s14 = sshll.u32 %s4267_s13, 4  ;;  %s67_s14 = int_to_ptr.vmem [resolvable:$true] %s66_s14 }
  0x3b   :  { %s4198_s0 = scalar_lea.vmem %s67_s14, 32000  ;;  %p4203_p12 = scmp.lt.s32.totalorder %s67_s14, %s67_s14 }
  0x3c   :  { %p4199_p11 = scmp.ne.s32.totalorder %s67_s14, %s4198_s0  ;;  %p4204_p13 = scmp.lt.s32.totalorder %s4198_s0, %s4198_s0 }
  0x3e   :  { %p4205_p0 = por %p4204_p13, %p4203_p12 }
  0x40   :  { %p4206_p1 = pnand %p4205_p0, %p4199_p11 }
  0x42   :  { %4209 = shalt.err (!%p4206_p1)
}
  0x43   :  { %s4268_s15 = smov 320   ;;  %s4269_s16 = smov 20  }
  0x44   :  { %72 = dma.hbm_to_vmem [thread:$0]  %s4511_s4, 32000, %s67_s14, [#allocation9], %s4268_s15, %s4268_s15, %s4269_s16  }
  0x45   :  { %s4270_s19 = smov [#allocation13]  }
  0x46   :  { %s90_s20 = sshll.u32 %s4270_s19, 4  ;;  %s91_s20 = int_to_ptr.vmem [resolvable:$true] %s90_s20 }
  0x47   :  { %s4218_s2 = scalar_lea.vmem %s91_s20, 4800  ;;  %p4223_p3 = scmp.lt.s32.totalorder %s91_s20, %s91_s20 }
  0x48   :  { %p4219_p2 = scmp.ne.s32.totalorder %s91_s20, %s4218_s2  ;;  %p4224_p4 = scmp.lt.s32.totalorder %s4218_s2, %s4218_s2 }
  0x4a   :  { %p4225_p5 = por %p4224_p4, %p4223_p3 }
  0x4c   :  { %p4226_p6 = pnand %p4225_p5, %p4219_p2 }
  0x4e   :  { %4229 = shalt.err (!%p4226_p6)
}
  0x4f   :  { %s4271_s21 = smov 64   ;;  %s4272_s22 = smov 4  }
  0x50   :  { %96 = dma.hbm_to_vmem [thread:$0]  %s4514_s7, 4800, %s91_s20, [#allocation12], %s4271_s21, %s4271_s21, %s4272_s22  }
  0x51   :  { %4250 = dma.done.wait [#allocation3], 128  }
  0x52   :  { %4251 = vsyncadd [#allocation3], 4294967168 }
  0x53   :  { %4252 = dma.done.wait [#allocation6], 1472  }
  0x54   :  { %4253 = vsyncadd [#allocation6], 4294965824 }
  0x55   :  { %4254 = dma.done.wait [#allocation9], 32112  }
  0x56   :  { %4255 = vsyncadd [#allocation9], 4294935184 }
  0x57   :  { %4256 = dma.done.wait [#allocation12], 5120  }
  0x58   :  { %4257 = vsyncadd [#allocation12], 4294962176  ;;  %v4273_v0 = vmov 0   ;;  %v132_v1 = vld [vmem:[#allocation7 + $0x38] sm:$0xff]  ;;  %vm231_vm0 = vcmask 1043456   ;;  %v133_v2 = vld [vmem:[#allocation7 + $0x40] sm:$0xff] }
  0x59   :  { %285 = vmatprep.mubr.bf16.mxu0 %v4273_v0  ;;  %326 = vmatprep.mubr.bf16.mxu1 %v4273_v0  ;;  %v3184_v3 = vcombine.high %v132_v1, %v132_v1  ;;  %v3186_v4 = vcombine.high %v133_v2, %v133_v2  ;;  %v3183_v5 = vcombine.low %v132_v1, %v132_v1  ;;  %v3684_v7 = vld [vmem:[#allocation7 + $0x4] ss:$28 sps:$4 sm:$0xff]   ;;  %v3686_v8 = vld [vmem:[#allocation7 + $0xc] ss:$28 sps:$4 sm:$0xff]   ;;  %v121_v14 = vld [vmem:[#allocation2] sm:$0xff]  ;;  %vm227_vm1 = vcmask 195584  }
  0x5a   :  { %v3185_v6 = vcombine.low %v133_v2, %v133_v2  ;;  %v3688_v9 = vld [vmem:[#allocation7] ss:$28 sps:$4 sm:$0xff]   ;;  %v3689_v12 = vld [vmem:[#allocation7 + $0x8] ss:$28 sps:$4 sm:$0xff]   ;;  %v3690_v15 = vld [vmem:[#allocation7 + $0x50] ss:$0 sps:$4 sm:$0xff]   ;;  %v123_v18 = vpack.c.bf16 %v121_v14, %v121_v14 }
  0x5b   :  { %3190 = vmatprep.subr.msk.bf16.mxu0 %vm231_vm0, %v3184_v3  ;;  %3192 = vmatprep.subr.msk.bf16.mxu1 %vm231_vm0, %v3186_v4  ;;  %v233_v10 = vsel %vm231_vm0, %v3183_v5, 0  ;;  %v134_v13 = vld [vmem:[#allocation7 + $0x48] sm:$0xff]  ;;  %v4274_v19 = vmov 0.0   ;;  %v251_v20 = vsel %vm231_vm0, %v3690_v15, 0  ;;  %v3696_v21 = vld [vmem:[#allocation7 + $0x14] ss:$28 sps:$4 sm:$0xff]  }
  0x5c   :  { %v239_v11 = vsel %vm231_vm0, %v3185_v6, 0  ;;  %266 = vmatpush1.bf16.msra.mxu0 %v233_v10  ;;  %v3188_v16 = vcombine.high %v134_v13, %v134_v13  ;;  %v3187_v17 = vcombine.low %v134_v13, %v134_v13  ;;  %v732_v23 = vld [vmem:[#allocation11 + $0x8] sm:$0x77]  ;;  %v731_v24 = vld [vmem:[#allocation11] sm:$0x77]  ;;  %vm4275_vm2 = vmmov 0  }
  0x5d   :  { %307 = vmatpush1.bf16.msra.mxu1 %v239_v11  ;;  %267 = vmatprep.subr.bf16.mxu0 %v3684_v7  ;;  %v3691_v25 = vld [vmem:[#allocation7 + $0x18] ss:$28 sps:$4 sm:$0xff]   ;;  %v3694_v26 = vld [vmem:[#allocation7 + $0x10] ss:$28 sps:$4 sm:$0xff]   ;;  %v3200_v27 = vcombine.high %v732_v23, %v732_v23  ;;  %v3199_v28 = vcombine.low %v732_v23, %v732_v23  ;;  %v3198_v29 = vcombine.high %v731_v24, %v731_v24  ;;  %vm751_vm3 = vcmask 1042432   ;;  %s4276_s25 = smov [#allocation14]  }
  0x5e   :  { %308 = vmatprep.subr.bf16.mxu1 %v3686_v8  ;;  %v245_v22 = vsel %vm231_vm0, %v3187_v17, 0  ;;  %v3197_v30 = vcombine.low %v731_v24, %v731_v24  ;;  %v3704_v33 = vld [vmem:[#allocation10 + $0x11c] ss:$20 sps:$4 sm:$0xff]   ;;  %v3701_v35 = vld [vmem:[#allocation11 + $0x10] ss:$0 sps:$4 sm:$0x77]  }
  0x5f   :  { %v759_v31 = vsel %vm751_vm3, %v3199_v28, 0  ;;  %v122_v34 = vld [vmem:[#allocation5] sm:$0xff]  ;;  %v3702_v37 = vld [vmem:[#allocation10 + $0x118] ss:$20 sps:$4 sm:$0xff]   ;;  %vm747_vm4 = vcmask 48128   ;;  %v765_v39 = vsel %vm751_vm3, %v3701_v35, 0 }
  0x60   :  { %268 = vmatpush1.bf16.msra.mxu0 %v3688_v9  ;;  %v753_v32 = vsel %vm751_vm3, %v3197_v30, 0  ;;  %v730_v36 = vpack.c.bf16 %v122_v34, %v122_v34  ;;  %v3707_v38 = vld [vmem:[#allocation10 + $0x39c] ss:$20 sps:$4 sm:$0xff]   ;;  %v3710_v40 = vld [vmem:[#allocation10 + $0xf4] ss:$20 sps:$4 sm:$0xff]   ;;  %vm2189_vm5 = vcmask 261120  }
  0x61   :  { %309 = vmatpush1.bf16.msra.mxu1 %v3689_v12  ;;  %3194 = vmatprep.subr.msk.bf16.mxu0 %vm231_vm0, %v3188_v16  ;;  %v3708_v41 = vld [vmem:[#allocation10 + $0xf0] ss:$20 sps:$4 sm:$0xff]   ;;  %v3716_v42 = vld [vmem:[#allocation10 + $0xcc] ss:$20 sps:$4 sm:$0xff]   ;;  %v3714_v43 = vld [vmem:[#allocation10 + $0xc8] ss:$20 sps:$4 sm:$0xff]  }
  0x62   :  { %3625 = vmatprep.subr.bf16.mxu1 %v4274_v19  ;;  %v3705_v44 = vld [vmem:[#allocation10 + $0x398] ss:$20 sps:$4 sm:$0xff]   ;;  %v3713_v46 = vld [vmem:[#allocation10 + $0x374] ss:$20 sps:$4 sm:$0xff]   ;;  %v3711_v48 = vld [vmem:[#allocation10 + $0x370] ss:$20 sps:$4 sm:$0xff]  }
  0x63   :  { %3191 = vmatmul.mubr.msk.bf16.vlgmr.msra.gmra.mxu0 %vm227_vm1, %v123_v18  ;;  %v3722_v45 = vld [vmem:[#allocation10 + $0xa4] ss:$20 sps:$4 sm:$0xff]   ;;  %v3720_v47 = vld [vmem:[#allocation10 + $0xa0] ss:$20 sps:$4 sm:$0xff]   ;;  %v3728_v49 = vld [vmem:[#allocation10 + $0x7c] ss:$20 sps:$4 sm:$0xff]  }
  0x64   :  { %3193 = vmatmul.mubr.msk.bf16.vlgmr.msra.gmra.mxu1 %vm227_vm1, %v123_v18  ;;  %348 = vmatpush1.bf16.msra.mxu0 %v245_v22  ;;  %v3719_v50 = vld [vmem:[#allocation10 + $0x34c] ss:$20 sps:$4 sm:$0xff]   ;;  %v3717_v52 = vld [vmem:[#allocation10 + $0x348] ss:$20 sps:$4 sm:$0xff]   ;;  %v3725_v54 = vld [vmem:[#allocation10 + $0x324] ss:$20 sps:$4 sm:$0xff]  }
  0x65   :  { %3626 = vmatpush3.bf16.msra.mxu1 %v251_v20  ;;  %3629 = vmatprep.mubr.msk.bf16.mxu1 %vm4275_vm2, %v4274_v19  ;;  %v3726_v51 = vld [vmem:[#allocation10 + $0x78] ss:$20 sps:$4 sm:$0xff]   ;;  %v3734_v53 = vld [vmem:[#allocation10 + $0x54] ss:$20 sps:$4 sm:$0xff]   ;;  %v3732_v56 = vld [vmem:[#allocation10 + $0x50] ss:$20 sps:$4 sm:$0xff]  }
  0x66   :  { %3627 = vmatprep.subr.bf16.mxu1 %v4274_v19  ;;  %349 = vmatprep.subr.bf16.mxu0 %v3696_v21  ;;  %v3723_v55 = vld [vmem:[#allocation10 + $0x320] ss:$20 sps:$4 sm:$0xff]   ;;  %v3731_v57 = vld [vmem:[#allocation10 + $0x2fc] ss:$20 sps:$4 sm:$0xff]   ;;  %v3729_v60 = vld [vmem:[#allocation10 + $0x2f8] ss:$20 sps:$4 sm:$0xff]  }
  0x67   :  { %367 = vmatprep.mubr.bf16.mxu0 %v4273_v0  ;;  %v3740_v58 = vld [vmem:[#allocation10 + $0x2c] ss:$20 sps:$4 sm:$0xff]   ;;  %v3738_v59 = vld [vmem:[#allocation10 + $0x28] ss:$20 sps:$4 sm:$0xff]   ;;  %v3746_v61 = vld [vmem:[#allocation10 + $0x4] ss:$20 sps:$4 sm:$0xff]  }
  0x68   :  { %350 = vmatpush1.bf16.msra.mxu0 %v3694_v26  ;;  %v3737_v62 = vld [vmem:[#allocation10 + $0x2d4] ss:$20 sps:$4 sm:$0xff]   ;;  %v3735_v1 = vld [vmem:[#allocation10 + $0x2d0] ss:$20 sps:$4 sm:$0xff]   ;;  %v3743_v3 = vld [vmem:[#allocation10 + $0x2ac] ss:$20 sps:$4 sm:$0xff]  }
  0x69   :  { %3628 = vmatpush3.bf16.msra.mxu1 %v3691_v25  ;;  %3202 = vmatprep.subr.msk.bf16.mxu0 %vm751_vm3, %v3198_v29  ;;  %v3744_v63 = vld [vmem:[#allocation10] ss:$20 sps:$4 sm:$0xff]   ;;  %v3752_v2 = vld [vmem:[#allocation10 + $0x25c] ss:$20 sps:$4 sm:$0xff]   ;;  %v3750_v4 = vld [vmem:[#allocation10 + $0x258] ss:$20 sps:$4 sm:$0xff]  }
  0x6a   :  { %3204 = vmatprep.subr.msk.bf16.mxu1 %vm751_vm3, %v3200_v27  ;;  %v3741_v5 = vld [vmem:[#allocation10 + $0x2a8] ss:$20 sps:$4 sm:$0xff]   ;;  %v3749_v7 = vld [vmem:[#allocation10 + $0x284] ss:$20 sps:$4 sm:$0xff]   ;;  %v3747_v9 = vld [vmem:[#allocation10 + $0x280] ss:$20 sps:$4 sm:$0xff]  }
  0x6b   :  { %3195 = vmatmul.mubr.msk.bf16.vlgmr.msra.gmra.mxu0 %vm227_vm1, %v123_v18  ;;  %v3758_v6 = vld [vmem:[#allocation10 + $0x234] ss:$20 sps:$4 sm:$0xff]   ;;  %v3756_v8 = vld [vmem:[#allocation10 + $0x230] ss:$20 sps:$4 sm:$0xff]   ;;  %v3764_v10 = vld [vmem:[#allocation10 + $0x20c] ss:$20 sps:$4 sm:$0xff]  }
  0x6c   :  { %3630 = vmatmul.mubr.msk.bf16.vlgmr.msra.gmra.mxu1 %vm227_vm1, %v123_v18  ;;  %782 = vmatpush1.bf16.msra.mxu0 %v753_v32  ;;  %v3755_v11 = vld [vmem:[#allocation10 + $0x4dc] ss:$20 sps:$4 sm:$0xff]   ;;  %v3753_v13 = vld [vmem:[#allocation10 + $0x4d8] ss:$20 sps:$4 sm:$0xff]   ;;  %v3761_v15 = vld [vmem:[#allocation10 + $0x4b4] ss:$20 sps:$4 sm:$0xff]  }
  0x6d   :  { %823 = vmatpush1.bf16.msra.mxu1 %v759_v31  ;;  %799 = vmatprep.mubr.bf16.mxu0 %v4273_v0  ;;  %v3762_v12 = vld [vmem:[#allocation10 + $0x208] ss:$20 sps:$4 sm:$0xff]   ;;  %v3770_v14 = vld [vmem:[#allocation10 + $0x1e4] ss:$20 sps:$4 sm:$0xff]   ;;  %v3768_v16 = vld [vmem:[#allocation10 + $0x1e0] ss:$20 sps:$4 sm:$0xff]  }
  0x6e   :  { %840 = vmatprep.mubr.bf16.mxu1 %v4273_v0  ;;  %3633 = vmatprep.subr.bf16.mxu0 %v4274_v19  ;;  %v3759_v17 = vld [vmem:[#allocation10 + $0x4b0] ss:$20 sps:$4 sm:$0xff]   ;;  %v3767_v20 = vld [vmem:[#allocation10 + $0x48c] ss:$20 sps:$4 sm:$0xff]   ;;  %v3765_v22 = vld [vmem:[#allocation10 + $0x488] ss:$20 sps:$4 sm:$0xff]  }
  0x6f   :  { %2193 = vmatprep.subr.bf16.mxu1 %v3704_v33  ;;  %v3776_v18 = vld [vmem:[#allocation10 + $0x1bc] ss:$20 sps:$4 sm:$0xff]   ;;  %v3774_v21 = vld [vmem:[#allocation10 + $0x1b8] ss:$20 sps:$4 sm:$0xff]   ;;  %v3782_v23 = vld [vmem:[#allocation10 + $0x194] ss:$20 sps:$4 sm:$0xff]  }
  0x70   :  { %v3773_v24 = vld [vmem:[#allocation10 + $0x464] ss:$20 sps:$4 sm:$0xff]   ;;  %v3771_v25 = vld [vmem:[#allocation10 + $0x460] ss:$20 sps:$4 sm:$0xff]   ;;  %v3779_v28 = vld [vmem:[#allocation10 + $0x43c] ss:$20 sps:$4 sm:$0xff]  }
  0x71   :  { %v3780_v26 = vld [vmem:[#allocation10 + $0x190] ss:$20 sps:$4 sm:$0xff]   ;;  %v3788_v27 = vld [vmem:[#allocation10 + $0x16c] ss:$20 sps:$4 sm:$0xff]   ;;  %v3786_v30 = vld [vmem:[#allocation10 + $0x168] ss:$20 sps:$4 sm:$0xff]  }
  0x72   :  { %v3777_v29 = vld [vmem:[#allocation10 + $0x438] ss:$20 sps:$4 sm:$0xff]   ;;  %v3785_v32 = vld [vmem:[#allocation10 + $0x414] ss:$20 sps:$4 sm:$0xff]   ;;  %v3783_v33 = vld [vmem:[#allocation10 + $0x410] ss:$20 sps:$4 sm:$0xff]  }
  0x73   :  { %3203 = vmatmul.mubr.msk.bf16.vlgmr.msra.gmra.mxu0 %vm747_vm4, %v730_v36  ;;  %v3794_v31 = vld [vmem:[#allocation10 + $0x144] ss:$20 sps:$4 sm:$0xff]   ;;  %v3792_v34 = vld [vmem:[#allocation10 + $0x140] ss:$20 sps:$4 sm:$0xff]   ;;  %v3800_v35 = vld [vmem:[#allocation10 + $0x61c] ss:$20 sps:$4 sm:$0xff]  }
  0x74   :  { %3205 = vmatmul.mubr.msk.bf16.vlgmr.msra.gmra.mxu1 %vm747_vm4, %v730_v36  ;;  %3634 = vmatpush3.bf16.msra.mxu0 %v765_v39  ;;  %v3795_v39 = vld [vmem:[#allocation10 + $0x3c0] ss:$20 sps:$4 sm:$0xff]   ;;  %vm3030_vm6 = vcmask 719872   ;;  %s3164_s26 = sshll.u32 %s4276_s25, 4  ;;  %s3165_s26 = int_to_ptr.vmem [resolvable:$true] %s3164_s26 }
  0x75   :  { %2194 = vmatpush1.bf16.msra.mxu1 %v3702_v37  ;;  %3635 = vmatprep.mubr.msk.bf16.mxu0 %vm4275_vm2, %v4274_v19  ;;  %v3789_v37 = vld [vmem:[#allocation10 + $0x3e8] ss:$20 sps:$4 sm:$0xff]   ;;  %s4230_s3 = scalar_lea.vmem %s3165_s26, 128  ;;  %p4235_p8 = scmp.lt.s32.totalorder %s3165_s26, %s3165_s26 }
  0x76   :  { %2234 = vmatprep.subr.bf16.mxu0 %v3707_v38  ;;  %2195 = vmatprep.subr.bf16.mxu1 %v3710_v40  ;;  %v3797_v38 = vld [vmem:[#allocation10 + $0x3c4] ss:$20 sps:$4 sm:$0xff]   ;;  %v3803_v40 = vld [vmem:[#allocation10 + $0x7ac] ss:$20 sps:$4 sm:$0xff]   ;;  %p4231_p7 = scmp.ne.s32.totalorder %s3165_s26, %s4230_s3  ;;  %p4236_p9 = scmp.lt.s32.totalorder %s4230_s3, %s4230_s3 }
  0x78   :  { %p4237_p10 = por %p4236_p9, %p4235_p8 }
  0x79   :  { %2196 = vmatpush1.bf16.msra.mxu1 %v3708_v41  ;;  %v138_v41 = vlaneseq }
  0x7a   :  { %2197 = vmatprep.subr.bf16.mxu1 %v3716_v42  ;;  %p4238_p11 = pnand %p4237_p10, %p4231_p7 }
  0x7b   :  { %3636 = vmatmul.mubr.msk.bf16.vlgmr.msra.gmra.mxu0 %vm747_vm4, %v730_v36  ;;  %v3791_v36 = vld [vmem:[#allocation10 + $0x3ec] ss:$20 sps:$4 sm:$0xff]   ;;  %v4379_v42 = vshrl.u32 %v138_v41, 7 }
  0x7c   :  { %2235 = vmatpush1.bf16.msra.mxu0 %v3705_v44 }
  0x7d   :  { %2198 = vmatpush1.bf16.msra.mxu1 %v3714_v43  ;;  %2236 = vmatprep.subr.bf16.mxu0 %v3713_v46  ;;  %v140_v43 = vsub.s32 0, %v4379_v42  ;;  %v148_v44 = vsub.s32 2, %v4379_v42  ;;  %v144_v46 = vsub.s32 1, %v4379_v42 }
  0x7e   :  { %2199 = vmatprep.subr.bf16.mxu1 %v3722_v45  ;;  %v4383_v45 = vld [vmem:[#allocation8] sm:$0x7f] }
  0x80   :  { %2237 = vmatpush1.bf16.msra.mxu0 %v3711_v48  ;;  %v141_v48 = vrot.slane %v4383_v45, %v140_v43 }
  0x81   :  { %2200 = vmatpush1.bf16.msra.mxu1 %v3720_v47  ;;  %2238 = vmatprep.subr.bf16.mxu0 %v3719_v50  ;;  %v152_v47 = vsub.s32 3, %v4379_v42  ;;  %v145_v50 = vrot.slane %v4383_v45, %v144_v46 }
  0x82   :  { %2201 = vmatprep.subr.bf16.mxu1 %v3728_v49  ;;  %v149_v49 = vrot.slane %v4383_v45, %v148_v44 }
  0x84   :  { %2239 = vmatpush1.bf16.msra.mxu0 %v3717_v52 }
  0x85   :  { %2202 = vmatpush1.bf16.msra.mxu1 %v3726_v51  ;;  %2240 = vmatprep.subr.bf16.mxu0 %v3725_v54  ;;  %v153_v51 = vrot.slane %v4383_v45, %v152_v47 }
  0x86   :  { %2203 = vmatprep.subr.bf16.mxu1 %v3734_v53 }
  0x88   :  { %2241 = vmatpush1.bf16.msra.mxu0 %v3723_v55 }
  0x89   :  { %2204 = vmatpush1.bf16.msra.mxu1 %v3732_v56  ;;  %2242 = vmatprep.subr.bf16.mxu0 %v3731_v57  ;;  %v164_v56 = vsub.s32 6, %v4379_v42 }
  0x8a   :  { %2205 = vmatprep.subr.bf16.mxu1 %v3740_v58 }
  0x8c   :  { %2243 = vmatpush1.bf16.msra.mxu0 %v3729_v60 }
  0x8d   :  { %2206 = vmatpush1.bf16.msra.mxu1 %v3738_v59  ;;  %2244 = vmatprep.subr.bf16.mxu0 %v3737_v62 }
  0x8e   :  { %2207 = vmatprep.subr.bf16.mxu1 %v3746_v61 }
  0x90   :  { %2245 = vmatpush1.bf16.msra.mxu0 %v3735_v1 }
  0x91   :  { %2208 = vmatpush1.bf16.msra.mxu1 %v3744_v63  ;;  %2246 = vmatprep.subr.bf16.mxu0 %v3743_v3 }
  0x92   :  { %2209 = vmatprep.subr.bf16.mxu1 %v3752_v2  ;;  %v160_v2 = vsub.s32 5, %v4379_v42 }
  0x94   :  { %2247 = vmatpush1.bf16.msra.mxu0 %v3741_v5  ;;  %v165_v5 = vrot.slane %v4383_v45, %v164_v56  ;;  %v3830_v56 = vld [vmem:[#allocation10 + $0x554] ss:$20 sps:$4 sm:$0xff]  }
  0x95   :  { %2210 = vmatpush2.bf16.msra.mxu1 %v3750_v4  ;;  %2248 = vmatprep.subr.bf16.mxu0 %v3749_v7 }
  0x96   :  { %2211 = vmatprep.subr.bf16.mxu1 %v3758_v6 }
  0x98   :  { %2249 = vmatpush1.bf16.msra.mxu0 %v3747_v9 }
  0x99   :  { %2212 = vmatpush2.bf16.msra.mxu1 %v3756_v8  ;;  %2250 = vmatprep.subr.bf16.mxu0 %v3755_v11  ;;  %v3798_v11 = vld [vmem:[#allocation10 + $0x618] ss:$20 sps:$4 sm:$0xff]  }
  0x9a   :  { %2213 = vmatprep.subr.bf16.mxu1 %v3764_v10 }
  0x9c   :  { %2251 = vmatpush2.bf16.msra.mxu0 %v3753_v13 }
  0x9d   :  { %2214 = vmatpush2.bf16.msra.mxu1 %v3762_v12  ;;  %2252 = vmatprep.subr.bf16.mxu0 %v3761_v15  ;;  %v3801_v12 = vld [vmem:[#allocation10 + $0x7a8] ss:$20 sps:$4 sm:$0xff]  }
  0x9e   :  { %2215 = vmatprep.subr.bf16.mxu1 %v3770_v14  ;;  %v3806_v15 = vld [vmem:[#allocation10 + $0x5f4] ss:$20 sps:$4 sm:$0xff]  }
  0xa0   :  { %2253 = vmatpush2.bf16.msra.mxu0 %v3759_v17  ;;  %v161_v17 = vrot.slane %v4383_v45, %v160_v2  ;;  %v3834_v2 = vld [vmem:[#allocation10 + $0x528] ss:$20 sps:$4 sm:$0xff]  }
  0xa1   :  { %2216 = vmatpush2.bf16.msra.mxu1 %v3768_v16  ;;  %2254 = vmatprep.subr.bf16.mxu0 %v3767_v20  ;;  %v3809_v16 = vld [vmem:[#allocation10 + $0x784] ss:$20 sps:$4 sm:$0xff]  }
  0xa2   :  { %2217 = vmatprep.subr.bf16.mxu1 %v3776_v18 }
  0xa4   :  { %2255 = vmatpush2.bf16.msra.mxu0 %v3765_v22 }
  0xa5   :  { %2218 = vmatpush2.bf16.msra.mxu1 %v3774_v21  ;;  %2256 = vmatprep.subr.bf16.mxu0 %v3773_v24  ;;  %v3807_v24 = vld [vmem:[#allocation10 + $0x780] ss:$20 sps:$4 sm:$0xff]  }
  0xa6   :  { %2219 = vmatprep.subr.bf16.mxu1 %v3782_v23  ;;  %v3804_v23 = vld [vmem:[#allocation10 + $0x5f0] ss:$20 sps:$4 sm:$0xff]  }
  0xa8   :  { %2257 = vmatpush2.bf16.msra.mxu0 %v3771_v25 }
  0xa9   :  { %2220 = vmatpush2.bf16.msra.mxu1 %v3780_v26  ;;  %2258 = vmatprep.subr.bf16.mxu0 %v3779_v28  ;;  %v3812_v26 = vld [vmem:[#allocation10 + $0x5cc] ss:$20 sps:$4 sm:$0xff]  }
  0xaa   :  { %2221 = vmatprep.subr.bf16.mxu1 %v3788_v27  ;;  %v3815_v27 = vld [vmem:[#allocation10 + $0x124] ss:$20 sps:$4 sm:$0xff]  }
  0xac   :  { %2259 = vmatpush2.bf16.msra.mxu0 %v3777_v29 }
  0xad   :  { %2222 = vmatpush2.bf16.msra.mxu1 %v3786_v30  ;;  %2260 = vmatprep.subr.bf16.mxu0 %v3785_v32 }
  0xae   :  { %2223 = vmatprep.subr.bf16.mxu1 %v3794_v31 }
  0xb0   :  { %2261 = vmatpush2.bf16.msra.mxu0 %v3783_v33 }
  0xb1   :  { %2224 = vmatpush2.bf16.msra.mxu1 %v3792_v34  ;;  %2262 = vmatprep.subr.bf16.mxu0 %v3791_v36  ;;  %v3810_v34 = vld [vmem:[#allocation10 + $0x5c8] ss:$20 sps:$4 sm:$0xff]  }
  0xb2   :  { %2275 = vmatprep.subr.bf16.mxu1 %v3800_v35  ;;  %v3813_v35 = vld [vmem:[#allocation10 + $0x120] ss:$20 sps:$4 sm:$0xff]  }
  0xb4   :  { %2263 = vmatpush2.bf16.msra.mxu0 %v3789_v37  ;;  %v3818_v37 = vld [vmem:[#allocation10 + $0x5a4] ss:$20 sps:$4 sm:$0xff]  }
  0xb5   :  { %2264 = vmatprep.subr.bf16.mxu0 %v3797_v38 }
  0xb8   :  { %2265 = vmatpush2.bf16.msra.mxu0 %v3795_v39 }
  0xb9   :  { %2328 = vmatprep.subr.bf16.mxu0 %v3803_v40  ;;  %v3821_v40 = vld [vmem:[#allocation10 + $0xfc] ss:$20 sps:$4 sm:$0xff]  }
 0x123   :  { %v287_v52 = vpop.f32.mrf.mxu0 }
 0x124   :  { %v328_v53 = vpop.f32.mrf.mxu1  ;;  %v288_v54 = vadd.f32 %v287_v52, %v141_v48  ;;  %v3816_v48 = vld [vmem:[#allocation10 + $0x5a0] ss:$20 sps:$4 sm:$0xff]  }
 0x125   :  { %v329_v55 = vadd.f32 %v328_v53, %v149_v49  ;;  %v289_v57 = vpop.f32.mrf.mxu0  ;;  %v3819_v49 = vld [vmem:[#allocation10 + $0xf8] ss:$20 sps:$4 sm:$0xff]  }
 0x126   :  { %v330_v58 = vpop.f32.mrf.mxu1  ;;  %v290_v60 = vadd.f32 %v289_v57, %v145_v50  ;;  %v416_v62 = vmax.f32 %v288_v54, 0.0  ;;  %v3824_v50 = vld [vmem:[#allocation10 + $0x57c] ss:$20 sps:$4 sm:$0xff]   ;;  %v3822_v54 = vld [vmem:[#allocation10 + $0x578] ss:$20 sps:$4 sm:$0xff]  }
 0x127   :  { %v418_v59 = vmax.f32 %v329_v55, 0.0  ;;  %v331_v61 = vadd.f32 %v330_v58, %v153_v51  ;;  %v291_v63 = vpop.f32.mrf.mxu0  ;;  %v3827_v51 = vld [vmem:[#allocation10 + $0xd4] ss:$20 sps:$4 sm:$0xff]   ;;  %v3825_v55 = vld [vmem:[#allocation10 + $0xd0] ss:$20 sps:$4 sm:$0xff]  }
 0x128   :  { %v332_v1 = vpop.f32.mrf.mxu1  ;;  %v417_v3 = vmax.f32 %v290_v60, 0.0  ;;  %v4408_v13 = vpack.c.bf16 %v416_v62, %v416_v62  ;;  %v3833_v57 = vld [vmem:[#allocation10 + $0xac] ss:$20 sps:$4 sm:$0xff]   ;;  %v3831_v60 = vld [vmem:[#allocation10 + $0xa8] ss:$20 sps:$4 sm:$0xff]  }
 0x129   :  { %v419_v4 = vmax.f32 %v331_v61, 0.0  ;;  %v4402_v6 = vpack.c.bf16 %v418_v59, %v418_v59  ;;  %v292_v7 = vpop.f32.mrf.mxu0  ;;  %v3828_v59 = vld [vmem:[#allocation10 + $0x550] ss:$20 sps:$4 sm:$0xff]   ;;  %v3836_v61 = vld [vmem:[#allocation10 + $0x52c] ss:$20 sps:$4 sm:$0xff]  }
 0x12a   :  { %v333_v8 = vpop.f32.mrf.mxu1  ;;  %v4404_v9 = vpack.c.bf16 %v417_v3, %v417_v3  ;;  %v3839_v62 = vld [vmem:[#allocation10 + $0x84] ss:$20 sps:$4 sm:$0xff]   ;;  %v3837_v3 = vld [vmem:[#allocation10 + $0x80] ss:$20 sps:$4 sm:$0xff]  }
 0x12b   :  { %v4406_v10 = vpack.c.bf16 %v419_v4, %v419_v4  ;;  %v4413_v20 = vpop.f32.mrf.mxu0  ;;  %v3842_v4 = vld [vmem:[#allocation10 + $0x504] ss:$20 sps:$4 sm:$0xff]  }
 0x12c   :  { %v410_v14 = vpop.f32.mrf.mxu1  ;;  %2225 = vmatprep.mubr.bf16.mxu1 %v4404_v9 }
 0x12d   :  { %2266 = vmatprep.mubr.bf16.mxu0 %v4406_v10  ;;  %v411_v18 = vadd.f32 %v410_v14, %v165_v5  ;;  %2226 = vmatmul.mubr.bf16.vlgmr.msra.gmra.mxu1 %v4408_v13  ;;  %v371_v25 = vpop.f32.mrf.mxu0  ;;  %v3845_v5 = vld [vmem:[#allocation10 + $0x5c] ss:$20 sps:$4 sm:$0xff]  }
 0x12e   :  { %2267 = vmatmul.mubr.bf16.vlgmr.msra.gmra.mxu0 %v4402_v6  ;;  %v3631_v21 = vpop.f32.mrf.mxu1  ;;  %2276 = vmatpush1.bf16.msra.mxu1 %v3798_v11  ;;  %v372_v29 = vadd.f32 %v371_v25, %v161_v17  ;;  %v3840_v11 = vld [vmem:[#allocation10 + $0x500] ss:$20 sps:$4 sm:$0xff]   ;;  %v3848_v14 = vld [vmem:[#allocation10 + $0x75c] ss:$20 sps:$4 sm:$0xff]  }
 0x12f   :  { %2329 = vmatpush1.bf16.msra.mxu0 %v3801_v12  ;;  %v422_v22 = vmax.f32 %v411_v18, 0.0  ;;  %2277 = vmatprep.subr.bf16.mxu1 %v3806_v15  ;;  %v373_v30 = vpop.f32.mrf.mxu0  ;;  %v3843_v12 = vld [vmem:[#allocation10 + $0x58] ss:$20 sps:$4 sm:$0xff]   ;;  %v3851_v15 = vld [vmem:[#allocation10 + $0x34] ss:$20 sps:$4 sm:$0xff]  }
 0x130   :  { %2330 = vmatprep.subr.bf16.mxu0 %v3809_v16  ;;  %v413_v28 = vpop.f32.mrf.mxu1  ;;  %2348 = vmatprep.mubr.bf16.mxu0 %v4273_v0  ;;  %v421_v33 = vmax.f32 %v372_v29, 0.0  ;;  %v3846_v18 = vld [vmem:[#allocation10 + $0x758] ss:$20 sps:$4 sm:$0xff]   ;;  %v3849_v21 = vld [vmem:[#allocation10 + $0x30] ss:$20 sps:$4 sm:$0xff]  }
 0x131   :  { %v4418_v31 = vpack.c.bf16 %v422_v22, %v422_v22  ;;  %v374_v36 = vpop.f32.mrf.mxu0  ;;  %v3854_v22 = vld [vmem:[#allocation10 + $0x734] ss:$20 sps:$4 sm:$0xff]   ;;  %v3852_v25 = vld [vmem:[#allocation10 + $0x730] ss:$20 sps:$4 sm:$0xff]  }
 0x132   :  { %v3632_v32 = vpop.f32.mrf.mxu1  ;;  %2278 = vmatpush1.bf16.msra.mxu1 %v3804_v23  ;;  %v4420_v38 = vpack.c.bf16 %v421_v33, %v421_v33  ;;  %v3857_v23 = vld [vmem:[#allocation10 + $0xc] ss:$20 sps:$4 sm:$0xff]   ;;  %v3863_v28 = vld [vmem:[#allocation10 + $0x264] ss:$20 sps:$4 sm:$0xff]   ;;  %v3858_v29 = vld [vmem:[#allocation10 + $0x708] ss:$20 sps:$4 sm:$0xff]  }
 0x133   :  { %2331 = vmatpush1.bf16.msra.mxu0 %v3807_v24  ;;  %2279 = vmatprep.subr.bf16.mxu1 %v3812_v26  ;;  %v4430_v58 = vpop.f32.mrf.mxu0  ;;  %v3855_v26 = vld [vmem:[#allocation10 + $0x8] ss:$20 sps:$4 sm:$0xff]   ;;  %v3861_v30 = vld [vmem:[#allocation10 + $0x260] ss:$20 sps:$4 sm:$0xff]   ;;  %v3866_v32 = vld [vmem:[#allocation10 + $0x6e4] ss:$20 sps:$4 sm:$0xff]  }
 0x134   :  { %2357 = vmatprep.subr.bf16.mxu0 %v3815_v27  ;;  %v4422_v39 = vpop.f32.mrf.mxu1  ;;  %2307 = vmatprep.mubr.bf16.mxu1 %v4420_v38  ;;  %v3860_v27 = vld [vmem:[#allocation10 + $0x70c] ss:$20 sps:$4 sm:$0xff]   ;;  %v3869_v33 = vld [vmem:[#allocation10 + $0x23c] ss:$20 sps:$4 sm:$0xff]  }
 0x135   :  { %v4432_v63 = vpop.f32.mrf.mxu0  ;;  %v3872_v36 = vld [vmem:[#allocation10 + $0x6bc] ss:$20 sps:$4 sm:$0xff]  }
 0x136   :  { %3457 = vmatmul.mubr.msk.bf16.vlgmr.msra.gmra.mxu0 %vm2189_vm5, %v4418_v31  ;;  %v4427_v41 = vpop.f32.mrf.mxu1  ;;  %2280 = vmatpush1.bf16.msra.mxu1 %v3810_v34  ;;  %v3864_v34 = vld [vmem:[#allocation10 + $0x6e0] ss:$20 sps:$4 sm:$0xff]  }
 0x137   :  { %2358 = vmatpush1.bf16.msra.mxu0 %v3813_v35  ;;  %2389 = vmatprep.mubr.bf16.mxu0 %v4404_v9  ;;  %v805_v1 = vpop.f32.mrf.mxu0  ;;  %v3867_v35 = vld [vmem:[#allocation10 + $0x238] ss:$20 sps:$4 sm:$0xff]  }
 0x138   :  { %2281 = vmatprep.subr.bf16.mxu1 %v3818_v37  ;;  %v846_v52 = vpop.f32.mrf.mxu1  ;;  %2359 = vmatprep.subr.bf16.mxu0 %v3821_v40  ;;  %v3875_v37 = vld [vmem:[#allocation10 + $0x214] ss:$20 sps:$4 sm:$0xff]   ;;  %v3870_v40 = vld [vmem:[#allocation10 + $0x6b8] ss:$20 sps:$4 sm:$0xff]  }
 0x139   :  { %v806_v7 = vpop.f32.mrf.mxu0  ;;  %v3876_v52 = vld [vmem:[#allocation10 + $0x690] ss:$20 sps:$4 sm:$0xff]   ;;  %v3888_v1 = vld [vmem:[#allocation10 + $0x640] ss:$20 sps:$4 sm:$0xff]  }
 0x13a   :  { %v847_v53 = vpop.f32.mrf.mxu1  ;;  %2282 = vmatpush1.bf16.msra.mxu1 %v3816_v48  ;;  %v3873_v48 = vld [vmem:[#allocation10 + $0x210] ss:$20 sps:$4 sm:$0xff]   ;;  %v3897_v7 = vld [vmem:[#allocation10 + $0x3a0] ss:$20 sps:$4 sm:$0xff]  }
 0x13b   :  { %2360 = vmatpush1.bf16.msra.mxu0 %v3819_v49  ;;  %2283 = vmatprep.subr.bf16.mxu1 %v3824_v50  ;;  %v4434_v8 = vpop.f32.mrf.mxu0  ;;  %v156_v49 = vsub.s32 4, %v4379_v42  ;;  %v3878_v50 = vld [vmem:[#allocation10 + $0x694] ss:$20 sps:$4 sm:$0xff]  }
 0x13c   :  { %2361 = vmatprep.subr.bf16.mxu0 %v3827_v51  ;;  %v3881_v51 = vld [vmem:[#allocation10 + $0x1ec] ss:$20 sps:$4 sm:$0xff]   ;;  %v3879_v53 = vld [vmem:[#allocation10 + $0x1e8] ss:$20 sps:$4 sm:$0xff]   ;;  %v3460_v42 = vld [vmem:[%s4515_s8] ss:$0 sm:$0xff] }
 0x13d   :  { %v3637_v16 = vpop.f32.mrf.mxu0 }
 0x13e   :  { %2284 = vmatpush1.bf16.msra.mxu1 %v3822_v54  ;;  %v157_v54 = vrot.slane %v4383_v45, %v156_v49  ;;  %v3896_v45 = vld [vmem:[#allocation10 + $0x174] ss:$20 sps:$4 sm:$0xff]  }
 0x13f   :  { %2362 = vmatpush1.bf16.msra.mxu0 %v3825_v55  ;;  %2285 = vmatprep.subr.bf16.mxu1 %v3830_v56  ;;  %v886_v17 = vpop.f32.mrf.mxu0  ;;  %v3884_v55 = vld [vmem:[#allocation10 + $0x66c] ss:$20 sps:$4 sm:$0xff]   ;;  %v3887_v56 = vld [vmem:[#allocation10 + $0x1c4] ss:$20 sps:$4 sm:$0xff]   ;;  %v3908_v16 = vld [vmem:[#allocation10 + $0x354] ss:$20 sps:$4 sm:$0xff]  }
 0x140   :  { %2363 = vmatprep.subr.bf16.mxu0 %v3833_v57  ;;  %v3882_v57 = vld [vmem:[#allocation10 + $0x668] ss:$20 sps:$4 sm:$0xff]   ;;  %v3911_v17 = vld [vmem:[#allocation10 + $0x624] ss:$20 sps:$4 sm:$0xff]  }
 0x141   :  { %v3638_v24 = vpop.f32.mrf.mxu0 }
 0x142   :  { %2286 = vmatpush1.bf16.msra.mxu1 %v3828_v59  ;;  %v3885_v59 = vld [vmem:[#allocation10 + $0x1c0] ss:$20 sps:$4 sm:$0xff]   ;;  %v3912_v24 = vld [vmem:[#allocation10 + $0x328] ss:$20 sps:$4 sm:$0xff]  }
 0x143   :  { %2364 = vmatpush1.bf16.msra.mxu0 %v3831_v60  ;;  %2287 = vmatprep.subr.bf16.mxu1 %v3836_v61  ;;  %v370_v60 = vadd.f32 %v4413_v20, %v157_v54  ;;  %v3890_v61 = vld [vmem:[#allocation10 + $0x644] ss:$20 sps:$4 sm:$0xff]   ;;  %v3902_v20 = vld [vmem:[#allocation10 + $0x14c] ss:$20 sps:$4 sm:$0xff]   ;;  %v3947_v54 = vld [vmem:[#allocation10 + $0x534] ss:$20 sps:$4 sm:$0xff]  }
 0x144   :  { %2365 = vmatprep.subr.bf16.mxu0 %v3839_v62  ;;  %v3893_v62 = vld [vmem:[#allocation10 + $0x19c] ss:$20 sps:$4 sm:$0xff]  }
 0x146   :  { %2288 = vmatpush1.bf16.msra.mxu1 %v3834_v2  ;;  %v3891_v2 = vld [vmem:[#allocation10 + $0x198] ss:$20 sps:$4 sm:$0xff]  }
 0x147   :  { %2366 = vmatpush1.bf16.msra.mxu0 %v3837_v3  ;;  %2289 = vmatprep.subr.bf16.mxu1 %v3842_v4  ;;  %v420_v3 = vmax.f32 %v370_v60, 0.0  ;;  %v3899_v4 = vld [vmem:[#allocation10 + $0x3a4] ss:$20 sps:$4 sm:$0xff]  }
 0x148   :  { %2367 = vmatprep.subr.bf16.mxu0 %v3845_v5  ;;  %v3894_v5 = vld [vmem:[#allocation10 + $0x170] ss:$20 sps:$4 sm:$0xff]   ;;  %v3948_v60 = vld [vmem:[#allocation10 + $0x4b8] ss:$20 sps:$4 sm:$0xff]  }
 0x14a   :  { %2290 = vmatpush1.bf16.msra.mxu1 %v3840_v11  ;;  %v4441_v11 = vpack.c.bf16 %v420_v3, %v420_v3  ;;  %v3957_v3 = vld [vmem:[#allocation10 + $0x760] ss:$20 sps:$4 sm:$0xff]  }
 0x14b   :  { %2368 = vmatpush1.bf16.msra.mxu0 %v3843_v12  ;;  %2291 = vmatprep.subr.bf16.mxu1 %v3848_v14  ;;  %v3905_v12 = vld [vmem:[#allocation10 + $0x37c] ss:$20 sps:$4 sm:$0xff]  }
 0x14c   :  { %2369 = vmatprep.subr.bf16.mxu0 %v3851_v15  ;;  %v3900_v14 = vld [vmem:[#allocation10 + $0x148] ss:$20 sps:$4 sm:$0xff]   ;;  %v3903_v15 = vld [vmem:[#allocation10 + $0x378] ss:$20 sps:$4 sm:$0xff]  }
 0x14e   :  { %2292 = vmatpush2.bf16.msra.mxu1 %v3846_v18  ;;  %v3906_v18 = vld [vmem:[#allocation10 + $0x350] ss:$20 sps:$4 sm:$0xff]  }
 0x14f   :  { %2370 = vmatpush1.bf16.msra.mxu0 %v3849_v21  ;;  %2293 = vmatprep.subr.bf16.mxu1 %v3854_v22  ;;  %v3909_v21 = vld [vmem:[#allocation10 + $0x620] ss:$20 sps:$4 sm:$0xff]  }
 0x150   :  { %2371 = vmatprep.subr.bf16.mxu0 %v3857_v23  ;;  %v3914_v22 = vld [vmem:[#allocation10 + $0x32c] ss:$20 sps:$4 sm:$0xff]   ;;  %v3917_v23 = vld [vmem:[#allocation10 + $0x5fc] ss:$20 sps:$4 sm:$0xff]  }
 0x152   :  { %2294 = vmatpush2.bf16.msra.mxu1 %v3852_v25  ;;  %v3915_v25 = vld [vmem:[#allocation10 + $0x5f8] ss:$20 sps:$4 sm:$0xff]  }
 0x153   :  { %2372 = vmatpush1.bf16.msra.mxu0 %v3855_v26  ;;  %2295 = vmatprep.subr.bf16.mxu1 %v3860_v27  ;;  %v3920_v26 = vld [vmem:[#allocation10 + $0x304] ss:$20 sps:$4 sm:$0xff]   ;;  %v3923_v27 = vld [vmem:[#allocation10 + $0x5d4] ss:$20 sps:$4 sm:$0xff]  }
 0x154   :  { %2373 = vmatprep.subr.bf16.mxu0 %v3863_v28  ;;  %v3918_v28 = vld [vmem:[#allocation10 + $0x300] ss:$20 sps:$4 sm:$0xff]  }
 0x156   :  { %2296 = vmatpush2.bf16.msra.mxu1 %v3858_v29  ;;  %v3921_v29 = vld [vmem:[#allocation10 + $0x5d0] ss:$20 sps:$4 sm:$0xff]  }
 0x157   :  { %2374 = vmatpush2.bf16.msra.mxu0 %v3861_v30  ;;  %2297 = vmatprep.subr.bf16.mxu1 %v3866_v32  ;;  %v3926_v30 = vld [vmem:[#allocation10 + $0x2dc] ss:$20 sps:$4 sm:$0xff]   ;;  %v3929_v32 = vld [vmem:[#allocation10 + $0x5ac] ss:$20 sps:$4 sm:$0xff]  }
 0x158   :  { %2375 = vmatprep.subr.bf16.mxu0 %v3869_v33  ;;  %v3924_v33 = vld [vmem:[#allocation10 + $0x2d8] ss:$20 sps:$4 sm:$0xff]  }
 0x15a   :  { %2298 = vmatpush2.bf16.msra.mxu1 %v3864_v34  ;;  %v3927_v34 = vld [vmem:[#allocation10 + $0x5a8] ss:$20 sps:$4 sm:$0xff]  }
 0x15b   :  { %2376 = vmatpush2.bf16.msra.mxu0 %v3867_v35  ;;  %2299 = vmatprep.subr.bf16.mxu1 %v3872_v36  ;;  %v3932_v35 = vld [vmem:[#allocation10 + $0x2b4] ss:$20 sps:$4 sm:$0xff]   ;;  %v3935_v36 = vld [vmem:[#allocation10 + $0x584] ss:$20 sps:$4 sm:$0xff]  }
 0x15c   :  { %2377 = vmatprep.subr.bf16.mxu0 %v3875_v37  ;;  %v3930_v37 = vld [vmem:[#allocation10 + $0x2b0] ss:$20 sps:$4 sm:$0xff]  }
 0x15e   :  { %2300 = vmatpush2.bf16.msra.mxu1 %v3870_v40  ;;  %v3933_v40 = vld [vmem:[#allocation10 + $0x580] ss:$20 sps:$4 sm:$0xff]  }
 0x15f   :  { %2378 = vmatpush2.bf16.msra.mxu0 %v3873_v48  ;;  %2301 = vmatprep.subr.bf16.mxu1 %v3878_v50  ;;  %v3938_v48 = vld [vmem:[#allocation10 + $0x28c] ss:$20 sps:$4 sm:$0xff]   ;;  %v3941_v50 = vld [vmem:[#allocation10 + $0x55c] ss:$20 sps:$4 sm:$0xff]  }
 0x160   :  { %2379 = vmatprep.subr.bf16.mxu0 %v3881_v51  ;;  %v3936_v51 = vld [vmem:[#allocation10 + $0x288] ss:$20 sps:$4 sm:$0xff]  }
 0x162   :  { %2302 = vmatpush2.bf16.msra.mxu1 %v3876_v52  ;;  %v3939_v52 = vld [vmem:[#allocation10 + $0x558] ss:$20 sps:$4 sm:$0xff]  }
 0x163   :  { %2380 = vmatpush2.bf16.msra.mxu0 %v3879_v53  ;;  %2303 = vmatprep.subr.bf16.mxu1 %v3884_v55  ;;  %v3944_v53 = vld [vmem:[#allocation10 + $0x4e4] ss:$20 sps:$4 sm:$0xff]   ;;  %v3942_v55 = vld [vmem:[#allocation10 + $0x4e0] ss:$20 sps:$4 sm:$0xff]  }
 0x164   :  { %2381 = vmatprep.subr.bf16.mxu0 %v3887_v56  ;;  %v3945_v56 = vld [vmem:[#allocation10 + $0x530] ss:$20 sps:$4 sm:$0xff]  }
 0x166   :  { %2304 = vmatpush2.bf16.msra.mxu1 %v3882_v57  ;;  %v3950_v57 = vld [vmem:[#allocation10 + $0x4bc] ss:$20 sps:$4 sm:$0xff]  }
 0x167   :  { %2382 = vmatpush2.bf16.msra.mxu0 %v3885_v59  ;;  %2305 = vmatprep.subr.bf16.mxu1 %v3890_v61  ;;  %v3953_v59 = vld [vmem:[#allocation10 + $0x50c] ss:$20 sps:$4 sm:$0xff]   ;;  %v3951_v61 = vld [vmem:[#allocation10 + $0x508] ss:$20 sps:$4 sm:$0xff]  }
 0x168   :  { %2383 = vmatprep.subr.bf16.mxu0 %v3893_v62  ;;  %v3956_v62 = vld [vmem:[#allocation10 + $0x494] ss:$20 sps:$4 sm:$0xff]  }
 0x16a   :  { %2306 = vmatpush2.bf16.msra.mxu1 %v3888_v1  ;;  %v3959_v1 = vld [vmem:[#allocation10 + $0x764] ss:$20 sps:$4 sm:$0xff]  }
 0x16b   :  { %2384 = vmatpush2.bf16.msra.mxu0 %v3891_v2  ;;  %2398 = vmatprep.subr.bf16.mxu1 %v3899_v4  ;;  %v3954_v2 = vld [vmem:[#allocation10 + $0x490] ss:$20 sps:$4 sm:$0xff]  }
 0x16c   :  { %2385 = vmatprep.subr.bf16.mxu0 %v3896_v45  ;;  %v3962_v45 = vld [vmem:[#allocation10 + $0x46c] ss:$20 sps:$4 sm:$0xff]   ;;  %v3965_v4 = vld [vmem:[#allocation10 + $0x73c] ss:$20 sps:$4 sm:$0xff]  }
 0x16d   :  { %2308 = vmatmul.mubr.bf16.vlgmr.msra.gmra.mxu1 %v4441_v11 }
 0x16e   :  { %2399 = vmatpush1.bf16.msra.mxu1 %v3897_v7  ;;  %2430 = vmatprep.mubr.bf16.mxu1 %v4406_v10  ;;  %v3963_v7 = vld [vmem:[#allocation10 + $0x738] ss:$20 sps:$4 sm:$0xff]  }
 0x16f   :  { %2386 = vmatpush2.bf16.msra.mxu0 %v3894_v5  ;;  %2400 = vmatprep.subr.bf16.mxu1 %v3905_v12  ;;  %v3960_v5 = vld [vmem:[#allocation10 + $0x468] ss:$20 sps:$4 sm:$0xff]  }
 0x170   :  { %2387 = vmatprep.subr.bf16.mxu0 %v3902_v20  ;;  %v3968_v20 = vld [vmem:[#allocation10 + $0x444] ss:$20 sps:$4 sm:$0xff]   ;;  %v3971_v12 = vld [vmem:[#allocation10 + $0x714] ss:$20 sps:$4 sm:$0xff]  }
 0x172   :  { %2401 = vmatpush1.bf16.msra.mxu1 %v3903_v15  ;;  %v3969_v15 = vld [vmem:[#allocation10 + $0x710] ss:$20 sps:$4 sm:$0xff]  }
 0x173   :  { %2388 = vmatpush2.bf16.msra.mxu0 %v3900_v14  ;;  %2402 = vmatprep.subr.bf16.mxu1 %v3908_v16  ;;  %v3966_v14 = vld [vmem:[#allocation10 + $0x440] ss:$20 sps:$4 sm:$0xff]   ;;  %v3974_v16 = vld [vmem:[#allocation10 + $0x41c] ss:$20 sps:$4 sm:$0xff]  }
 0x174   :  { %2439 = vmatprep.subr.bf16.mxu0 %v3911_v17  ;;  %v3977_v17 = vld [vmem:[#allocation10 + $0x6ec] ss:$20 sps:$4 sm:$0xff]  }
 0x176   :  { %2390 = vmatmul.mubr.bf16.vlgmr.msra.gmra.mxu0 %v4408_v13  ;;  %2403 = vmatpush1.bf16.msra.mxu1 %v3906_v18  ;;  %v3972_v18 = vld [vmem:[#allocation10 + $0x418] ss:$20 sps:$4 sm:$0xff]  }
 0x177   :  { %2440 = vmatpush1.bf16.msra.mxu0 %v3909_v21  ;;  %2471 = vmatprep.mubr.bf16.mxu0 %v4420_v38  ;;  %v3975_v21 = vld [vmem:[#allocation10 + $0x6e8] ss:$20 sps:$4 sm:$0xff]  }
 0x178   :  { %2404 = vmatprep.subr.bf16.mxu1 %v3914_v22  ;;  %2441 = vmatprep.subr.bf16.mxu0 %v3917_v23  ;;  %v3980_v22 = vld [vmem:[#allocation10 + $0x3f4] ss:$20 sps:$4 sm:$0xff]   ;;  %v3983_v23 = vld [vmem:[#allocation10 + $0x6c4] ss:$20 sps:$4 sm:$0xff]  }
 0x17a   :  { %2405 = vmatpush1.bf16.msra.mxu1 %v3912_v24  ;;  %v3978_v24 = vld [vmem:[#allocation10 + $0x3f0] ss:$20 sps:$4 sm:$0xff]  }
 0x17b   :  { %2442 = vmatpush1.bf16.msra.mxu0 %v3915_v25  ;;  %2406 = vmatprep.subr.bf16.mxu1 %v3920_v26  ;;  %v3981_v25 = vld [vmem:[#allocation10 + $0x6c0] ss:$20 sps:$4 sm:$0xff]  }
 0x17c   :  { %2443 = vmatprep.subr.bf16.mxu0 %v3923_v27  ;;  %v3986_v26 = vld [vmem:[#allocation10 + $0x3cc] ss:$20 sps:$4 sm:$0xff]   ;;  %v3989_v27 = vld [vmem:[#allocation10 + $0x69c] ss:$20 sps:$4 sm:$0xff]  }
 0x17e   :  { %2407 = vmatpush1.bf16.msra.mxu1 %v3918_v28  ;;  %v3984_v28 = vld [vmem:[#allocation10 + $0x3c8] ss:$20 sps:$4 sm:$0xff]  }
 0x17f   :  { %2444 = vmatpush1.bf16.msra.mxu0 %v3921_v29  ;;  %2408 = vmatprep.subr.bf16.mxu1 %v3926_v30  ;;  %v3987_v29 = vld [vmem:[#allocation10 + $0x698] ss:$20 sps:$4 sm:$0xff]   ;;  %v3992_v30 = vld [vmem:[#allocation10 + $0x674] ss:$20 sps:$4 sm:$0xff]  }
 0x180   :  { %2445 = vmatprep.subr.bf16.mxu0 %v3929_v32  ;;  %v3995_v32 = vld [vmem:[#allocation10 + $0x7b4] ss:$20 sps:$4 sm:$0xff]  }
 0x182   :  { %2409 = vmatpush1.bf16.msra.mxu1 %v3924_v33  ;;  %v3990_v33 = vld [vmem:[#allocation10 + $0x670] ss:$20 sps:$4 sm:$0xff]  }
 0x183   :  { %2446 = vmatpush1.bf16.msra.mxu0 %v3927_v34  ;;  %2410 = vmatprep.subr.bf16.mxu1 %v3932_v35  ;;  %v3993_v34 = vld [vmem:[#allocation10 + $0x7b0] ss:$20 sps:$4 sm:$0xff]   ;;  %v3998_v35 = vld [vmem:[#allocation10 + $0x64c] ss:$20 sps:$4 sm:$0xff]  }
 0x184   :  { %2447 = vmatprep.subr.bf16.mxu0 %v3935_v36  ;;  %v4001_v36 = vld [vmem:[#allocation10 + $0x78c] ss:$20 sps:$4 sm:$0xff]  }
 0x186   :  { %2411 = vmatpush1.bf16.msra.mxu1 %v3930_v37  ;;  %v3996_v37 = vld [vmem:[#allocation10 + $0x648] ss:$20 sps:$4 sm:$0xff]  }
 0x187   :  { %2448 = vmatpush1.bf16.msra.mxu0 %v3933_v40  ;;  %2412 = vmatprep.subr.bf16.mxu1 %v3938_v48  ;;  %v3999_v40 = vld [vmem:[#allocation10 + $0x788] ss:$20 sps:$4 sm:$0xff]  }
 0x188   :  { %2449 = vmatprep.subr.bf16.mxu0 %v3941_v50  ;;  %v4002_v48 = vld [vmem:[#allocation10 + $0x268] ss:$20 sps:$4 sm:$0xff]  }
 0x189   :  { %v4003_v50 = vld [vmem:[#allocation10 + $0x4e8] ss:$20 sps:$4 sm:$0xff]  }
 0x18a   :  { %2413 = vmatpush1.bf16.msra.mxu1 %v3936_v51  ;;  %v4004_v51 = vld [vmem:[#allocation10 + $0x128] ss:$20 sps:$4 sm:$0xff]  }
 0x18b   :  { %2450 = vmatpush1.bf16.msra.mxu0 %v3939_v52  ;;  %2414 = vmatprep.subr.bf16.mxu1 %v3944_v53  ;;  %v4005_v52 = vld [vmem:[#allocation10 + $0x3a8] ss:$20 sps:$4 sm:$0xff]   ;;  %v4006_v53 = vld [vmem:[#allocation10 + $0x240] ss:$20 sps:$4 sm:$0xff]  }
 0x18c   :  { %2451 = vmatprep.subr.bf16.mxu0 %v3947_v54  ;;  %v4007_v54 = vld [vmem:[#allocation10 + $0x4c0] ss:$20 sps:$4 sm:$0xff]  }
 0x18e   :  { %2415 = vmatpush2.bf16.msra.mxu1 %v3942_v55  ;;  %v4008_v55 = vld [vmem:[#allocation10 + $0x100] ss:$20 sps:$4 sm:$0xff]  }
 0x18f   :  { %2452 = vmatpush1.bf16.msra.mxu0 %v3945_v56  ;;  %2416 = vmatprep.subr.bf16.mxu1 %v3950_v57  ;;  %v4010_v56 = vld [vmem:[#allocation10 + $0x218] ss:$20 sps:$4 sm:$0xff]  }
 0x190   :  { %2453 = vmatprep.subr.bf16.mxu0 %v3953_v59  ;;  %v4011_v57 = vld [vmem:[#allocation10 + $0x498] ss:$20 sps:$4 sm:$0xff]  }
 0x191   :  { %v4012_v59 = vld [vmem:[#allocation10 + $0xd8] ss:$20 sps:$4 sm:$0xff]  }
 0x192   :  { %2417 = vmatpush2.bf16.msra.mxu1 %v3948_v60  ;;  %v4013_v60 = vld [vmem:[#allocation10 + $0x358] ss:$20 sps:$4 sm:$0xff]  }
 0x193   :  { %2454 = vmatpush1.bf16.msra.mxu0 %v3951_v61  ;;  %2418 = vmatprep.subr.bf16.mxu1 %v3956_v62  ;;  %v4014_v61 = vld [vmem:[#allocation10 + $0x1f0] ss:$20 sps:$4 sm:$0xff]  }
 0x194   :  { %2455 = vmatprep.subr.bf16.mxu0 %v3959_v1  ;;  %v4015_v62 = vld [vmem:[#allocation10 + $0x470] ss:$20 sps:$4 sm:$0xff]  }
 0x195   :  { %v4016_v1 = vld [vmem:[#allocation10 + $0xb0] ss:$20 sps:$4 sm:$0xff]  }
 0x196   :  { %2419 = vmatpush2.bf16.msra.mxu1 %v3954_v2  ;;  %v4018_v2 = vld [vmem:[#allocation10 + $0x1c8] ss:$20 sps:$4 sm:$0xff]  }
 0x197   :  { %2456 = vmatpush2.bf16.msra.mxu0 %v3957_v3  ;;  %2420 = vmatprep.subr.bf16.mxu1 %v3962_v45  ;;  %v4020_v3 = vld [vmem:[#allocation10 + $0x88] ss:$20 sps:$4 sm:$0xff]  }
 0x198   :  { %2457 = vmatprep.subr.bf16.mxu0 %v3965_v4  ;;  %v4021_v45 = vld [vmem:[#allocation10 + $0x308] ss:$20 sps:$4 sm:$0xff]   ;;  %v4022_v4 = vld [vmem:[#allocation10 + $0x1a0] ss:$20 sps:$4 sm:$0xff]  }
 0x19a   :  { %2421 = vmatpush2.bf16.msra.mxu1 %v3960_v5  ;;  %v4023_v5 = vld [vmem:[#allocation10 + $0x420] ss:$20 sps:$4 sm:$0xff]  }
 0x19b   :  { %2458 = vmatpush2.bf16.msra.mxu0 %v3963_v7  ;;  %2422 = vmatprep.subr.bf16.mxu1 %v3968_v20  ;;  %v4024_v7 = vld [vmem:[#allocation10 + $0x60] ss:$20 sps:$4 sm:$0xff]  }
 0x19c   :  { %2459 = vmatprep.subr.bf16.mxu0 %v3971_v12  ;;  %v4025_v20 = vld [vmem:[#allocation10 + $0x2e0] ss:$20 sps:$4 sm:$0xff]   ;;  %v4026_v12 = vld [vmem:[#allocation10 + $0x178] ss:$20 sps:$4 sm:$0xff]  }
 0x19e   :  { %2423 = vmatpush2.bf16.msra.mxu1 %v3966_v14  ;;  %v4027_v14 = vld [vmem:[#allocation10 + $0x3f8] ss:$20 sps:$4 sm:$0xff]  }
 0x19f   :  { %2460 = vmatpush2.bf16.msra.mxu0 %v3969_v15  ;;  %2424 = vmatprep.subr.bf16.mxu1 %v3974_v16  ;;  %v4028_v15 = vld [vmem:[#allocation10 + $0x38] ss:$20 sps:$4 sm:$0xff]  }
 0x1a0   :  { %2461 = vmatprep.subr.bf16.mxu0 %v3977_v17  ;;  %v4029_v16 = vld [vmem:[#allocation10 + $0x2b8] ss:$20 sps:$4 sm:$0xff]   ;;  %v4030_v17 = vld [vmem:[#allocation10 + $0x150] ss:$20 sps:$4 sm:$0xff]  }
 0x1a2   :  { %2425 = vmatpush2.bf16.msra.mxu1 %v3972_v18  ;;  %v4031_v18 = vld [vmem:[#allocation10 + $0x3d0] ss:$20 sps:$4 sm:$0xff]  }
 0x1a3   :  { %2462 = vmatpush2.bf16.msra.mxu0 %v3975_v21  ;;  %2426 = vmatprep.subr.bf16.mxu1 %v3980_v22  ;;  %v4032_v21 = vld [vmem:[#allocation10 + $0x10] ss:$20 sps:$4 sm:$0xff]  }
 0x1a4   :  { %2463 = vmatprep.subr.bf16.mxu0 %v3983_v23  ;;  %v4033_v22 = vld [vmem:[#allocation10 + $0x290] ss:$20 sps:$4 sm:$0xff]   ;;  %v4034_v23 = vld [vmem:[#allocation10 + $0x768] ss:$20 sps:$4 sm:$0xff]  }
 0x1a6   :  { %2427 = vmatpush2.bf16.msra.mxu1 %v3978_v24  ;;  %v4035_v24 = vld [vmem:[#allocation10 + $0x628] ss:$20 sps:$4 sm:$0xff]  }
 0x1a7   :  { %2464 = vmatpush2.bf16.msra.mxu0 %v3981_v25  ;;  %2428 = vmatprep.subr.bf16.mxu1 %v3986_v26  ;;  %v4036_v25 = vld [vmem:[#allocation10 + $0x7b8] ss:$20 sps:$4 sm:$0xff]   ;;  %v4037_v26 = vld [vmem:[#allocation10 + $0x740] ss:$20 sps:$4 sm:$0xff]  }
 0x1a8   :  { %2465 = vmatprep.subr.bf16.mxu0 %v3989_v27  ;;  %v4038_v27 = vld [vmem:[#allocation10 + $0x600] ss:$20 sps:$4 sm:$0xff]  }
 0x1aa   :  { %2429 = vmatpush2.bf16.msra.mxu1 %v3984_v28  ;;  %v4039_v28 = vld [vmem:[#allocation10 + $0x790] ss:$20 sps:$4 sm:$0xff]  }
 0x1ab   :  { %2466 = vmatpush2.bf16.msra.mxu0 %v3987_v29  ;;  %2492 = vmatprep.subr.bf16.mxu1 %v3995_v32  ;;  %v4040_v29 = vld [vmem:[#allocation10 + $0x718] ss:$20 sps:$4 sm:$0xff]  }
 0x1ac   :  { %2467 = vmatprep.subr.bf16.mxu0 %v3992_v30  ;;  %v4052_v30 = vld [vmem:[#allocation13 + $0x78] sm:$0xff]   ;;  %v4041_v32 = vld [vmem:[#allocation10 + $0x5d8] ss:$20 sps:$4 sm:$0xff]  }
 0x1ad   :  { %2431 = vmatmul.mubr.bf16.vlgmr.msra.gmra.mxu1 %v4402_v6 }
 0x1ae   :  { %2493 = vmatpush1.bf16.msra.mxu1 %v3993_v34  ;;  %2512 = vmatprep.mubr.bf16.mxu1 %v4273_v0  ;;  %v4009_v0 = vld [vmem:[#allocation10 + $0x380] ss:$20 sps:$4 sm:$0xff]   ;;  %v4044_v34 = vld [vmem:[#allocation10 + $0x6c8] ss:$20 sps:$4 sm:$0xff]  }
 0x1af   :  { %2468 = vmatpush2.bf16.msra.mxu0 %v3990_v33  ;;  %2494 = vmatprep.subr.bf16.mxu1 %v4001_v36  ;;  %v4054_v33 = vld [vmem:[#allocation13 + $0x70] sm:$0xff]   ;;  %v4056_v36 = vld [vmem:[#allocation13 + $0x68] sm:$0xff]  }
 0x1b0   :  { %2469 = vmatprep.subr.bf16.mxu0 %v3998_v35  ;;  %v4055_v35 = vld [vmem:[#allocation13 + $0x30] sm:$0xff]  }
 0x1b2   :  { %2495 = vmatpush1.bf16.msra.mxu1 %v3999_v40  ;;  %v4046_v40 = vld [vmem:[#allocation10 + $0x6a0] ss:$20 sps:$4 sm:$0xff]  }
 0x1b3   :  { %2470 = vmatpush2.bf16.msra.mxu0 %v3996_v37  ;;  %3505 = vmatprep.subr.bf16.mxu1 %v4002_v48  ;;  %v4045_v37 = vld [vmem:[#allocation10 + $0x588] ss:$20 sps:$4 sm:$0xff]   ;;  %v4057_v48 = vld [vmem:[#allocation13 + $0x28] sm:$0xff]  }
 0x1b4   :  { %3527 = vmatprep.subr.bf16.mxu0 %v4003_v50  ;;  %v4058_v50 = vld [vmem:[#allocation13 + $0x60] sm:$0xff]  }
 0x1b5   :  { %3458 = vmatmul.mubr.msk.bf16.vlgmr.msra.gmra.mxu1 %vm2189_vm5, %v4418_v31 }
 0x1b6   :  { %2472 = vmatmul.mubr.bf16.vlgmr.msra.gmra.mxu0 %v4441_v11  ;;  %3506 = vmatpush3.bf16.msra.mxu1 %v4004_v51  ;;  %v4047_v51 = vld [vmem:[#allocation10 + $0x560] ss:$20 sps:$4 sm:$0xff]  }
 0x1b7   :  { %2553 = vmatprep.mubr.bf16.mxu1 %v4404_v9  ;;  %3528 = vmatpush3.bf16.msra.mxu0 %v4005_v52  ;;  %v4017_v9 = vld [vmem:[#allocation10 + $0x330] ss:$20 sps:$4 sm:$0xff]  }
 0x1b8   :  { %2593 = vmatprep.mubr.bf16.mxu0 %v4406_v10  ;;  %3507 = vmatprep.subr.bf16.mxu1 %v4006_v53  ;;  %v4019_v10 = vld [vmem:[#allocation10 + $0x448] ss:$20 sps:$4 sm:$0xff]  }
 0x1b9   :  { %3529 = vmatprep.subr.bf16.mxu0 %v4007_v54  ;;  %v4059_v52 = vld [vmem:[#allocation13 + $0x20] sm:$0xff]   ;;  %v4060_v53 = vld [vmem:[#allocation13 + $0x58] sm:$0xff]   ;;  %v4049_v54 = vld [vmem:[#allocation10 + $0x538] ss:$20 sps:$4 sm:$0xff]  }
 0x1ba   :  { %3508 = vmatpush3.bf16.msra.mxu1 %v4008_v55  ;;  %v4050_v55 = vld [vmem:[#allocation10 + $0x650] ss:$20 sps:$4 sm:$0xff]  }
 0x1bb   :  { %3530 = vmatpush3.bf16.msra.mxu0 %v4009_v0  ;;  %3509 = vmatprep.subr.bf16.mxu1 %v4010_v56  ;;  %v4061_v0 = vld [vmem:[#allocation13 + $0x18] sm:$0xff]   ;;  %v4062_v56 = vld [vmem:[#allocation13 + $0x50] sm:$0xff]  }
 0x1bc   :  { %3531 = vmatprep.subr.bf16.mxu0 %v4011_v57 }
 0x1be   :  { %3510 = vmatpush3.bf16.msra.mxu1 %v4012_v59 }
 0x1bf   :  { %3532 = vmatpush3.bf16.msra.mxu0 %v4013_v60  ;;  %3511 = vmatprep.subr.bf16.mxu1 %v4014_v61  ;;  %v4051_v60 = vld [vmem:[#allocation10 + $0x510] ss:$20 sps:$4 sm:$0xff]  }
 0x1c0   :  { %3533 = vmatprep.subr.bf16.mxu0 %v4015_v62 }
 0x1c2   :  { %3512 = vmatpush3.bf16.msra.mxu1 %v4016_v1  ;;  %v4063_v1 = vld [vmem:[#allocation13 + $0x10] sm:$0xff]  }
 0x1c3   :  { %3534 = vmatpush3.bf16.msra.mxu0 %v4017_v9  ;;  %3513 = vmatprep.subr.bf16.mxu1 %v4018_v2  ;;  %v4068_v9 = vld [vmem:[#allocation13 + $0xf8] sm:$0xff]   ;;  %v4064_v2 = vld [vmem:[#allocation13 + $0x48] sm:$0xff]  }
 0x1c4   :  { %3535 = vmatprep.subr.bf16.mxu0 %v4019_v10 }
 0x1c6   :  { %3514 = vmatpush3.bf16.msra.mxu1 %v4020_v3 }
 0x1c7   :  { %3536 = vmatpush3.bf16.msra.mxu0 %v4021_v45  ;;  %3515 = vmatprep.subr.bf16.mxu1 %v4022_v4  ;;  %v4069_v45 = vld [vmem:[#allocation13 + $0xb8] sm:$0xff]  }
 0x1c8   :  { %3537 = vmatprep.subr.bf16.mxu0 %v4023_v5 }
 0x1ca   :  { %3516 = vmatpush3.bf16.msra.mxu1 %v4024_v7  ;;  %v4065_v7 = vld [vmem:[#allocation13 + $0x8] sm:$0xff]  }
 0x1cb   :  { %3538 = vmatpush3.bf16.msra.mxu0 %v4025_v20  ;;  %3517 = vmatprep.subr.bf16.mxu1 %v4026_v12  ;;  %v4070_v20 = vld [vmem:[#allocation13 + $0xf0] sm:$0xff]   ;;  %v4066_v12 = vld [vmem:[#allocation13 + $0x40] sm:$0xff]  }
 0x1cc   :  { %3539 = vmatprep.subr.bf16.mxu0 %v4027_v14 }
 0x1ce   :  { %3518 = vmatpush3.bf16.msra.mxu1 %v4028_v15  ;;  %v4071_v15 = vld [vmem:[#allocation13 + $0xb0] sm:$0xff]  }
 0x1cf   :  { %3540 = vmatpush3.bf16.msra.mxu0 %v4029_v16  ;;  %3519 = vmatprep.subr.bf16.mxu1 %v4030_v17  ;;  %v4067_v17 = vld [vmem:[#allocation13] sm:$0xff]  }
 0x1d0   :  { %3541 = vmatprep.subr.bf16.mxu0 %v4031_v18  ;;  %v4072_v18 = vld [vmem:[#allocation13 + $0xe8] sm:$0xff]  }
 0x1d2   :  { %3520 = vmatpush3.bf16.msra.mxu1 %v4032_v21 }
 0x1d3   :  { %3542 = vmatpush3.bf16.msra.mxu0 %v4033_v22  ;;  %3549 = vmatprep.subr.bf16.mxu1 %v4034_v23  ;;  %v4073_v22 = vld [vmem:[#allocation13 + $0xa8] sm:$0xff]  }
 0x1d4   :  { %3639 = vmatprep.subr.bf16.mxu0 %v4274_v19 }
 0x1d5   :  { %2554 = vmatmul.mubr.bf16.vlgmr.msra.gmra.mxu1 %v4408_v13  ;;  %v4042_v13 = vld [vmem:[#allocation10 + $0x6f0] ss:$20 sps:$4 sm:$0xff]  }
 0x1d6   :  { %2594 = vmatmul.mubr.bf16.vlgmr.msra.gmra.mxu0 %v4402_v6  ;;  %3550 = vmatpush3.bf16.msra.mxu1 %v4035_v24  ;;  %v4053_v6 = vld [vmem:[#allocation13 + $0x38] sm:$0xff]   ;;  %v4074_v24 = vld [vmem:[#allocation13 + $0xe0] sm:$0xff]  }
 0x1d7   :  { %2633 = vmatprep.mubr.bf16.mxu1 %v4420_v38  ;;  %3640 = vmatpush3.bf16.msra.mxu0 %v4036_v25  ;;  %v4043_v38 = vld [vmem:[#allocation10 + $0x5b0] ss:$20 sps:$4 sm:$0xff]   ;;  %v4076_v25 = vld [vmem:[#allocation13 + $0xd8] sm:$0xff]  }
 0x1d8   :  { %3551 = vmatprep.subr.bf16.mxu1 %v4037_v26  ;;  %3641 = vmatprep.subr.bf16.mxu0 %v4274_v19  ;;  %v4077_v26 = vld [vmem:[#allocation13 + $0x98] sm:$0xff]  }
 0x1d9   :  { %3643 = vmatprep.mubr.msk.bf16.mxu0 %vm4275_vm2, %v4274_v19 }
 0x1da   :  { %3552 = vmatpush3.bf16.msra.mxu1 %v4038_v27  ;;  %v4078_v27 = vld [vmem:[#allocation13 + $0xd0] sm:$0xff]  }
 0x1db   :  { %3642 = vmatpush3.bf16.msra.mxu0 %v4039_v28  ;;  %3553 = vmatprep.subr.bf16.mxu1 %v4040_v29  ;;  %v4079_v28 = vld [vmem:[#allocation13 + $0x90] sm:$0xff]   ;;  %v4080_v29 = vld [vmem:[#allocation13 + $0xc8] sm:$0xff]  }
 0x1dc   :  { %3574 = vmatprep.subr.bf16.mxu0 %v4052_v30  ;;  %v4081_v30 = vld [vmem:[#allocation13 + $0x88] sm:$0xff]  }
 0x1de   :  { %3644 = vmatmul.mubr.msk.bf16.vlgmr.msra.gmra.mxu0 %vm2189_vm5, %v4418_v31  ;;  %3554 = vmatpush3.bf16.msra.mxu1 %v4041_v32  ;;  %v4048_v31 = vld [vmem:[#allocation10 + $0x678] ss:$20 sps:$4 sm:$0xff]   ;;  %v4082_v32 = vld [vmem:[#allocation13 + $0xc0] sm:$0xff]  }
 0x1df   :  { %3555 = vmatprep.subr.bf16.mxu1 %v4042_v13  ;;  %3575 = vmatpush3.bf16.msra.mxu0 %v4053_v6  ;;  %v4083_v13 = vld [vmem:[#allocation13 + $0x80] sm:$0xff]  }
 0x1e0   :  { %3576 = vmatprep.subr.bf16.mxu0 %v4054_v33 }
 0x1e2   :  { %3556 = vmatpush3.bf16.msra.mxu1 %v4043_v38  ;;  %v4472_v38 = vld [vmem:[%s4512_s5] sm:$0x1f] }
 0x1e3   :  { %3557 = vmatprep.subr.bf16.mxu1 %v4044_v34  ;;  %3577 = vmatpush3.bf16.msra.mxu0 %v4055_v35 }
 0x1e4   :  { %3578 = vmatprep.subr.bf16.mxu0 %v4056_v36 }
 0x1e6   :  { %3558 = vmatpush3.bf16.msra.mxu1 %v4045_v37 }
 0x1e7   :  { %3559 = vmatprep.subr.bf16.mxu1 %v4046_v40  ;;  %3579 = vmatpush3.bf16.msra.mxu0 %v4057_v48  ;;  %v2686_v40 = vrot.slane %v4472_v38, %v140_v43 }
 0x1e8   :  { %3580 = vmatprep.subr.bf16.mxu0 %v4058_v50 }
 0x1ea   :  { %3560 = vmatpush3.bf16.msra.mxu1 %v4047_v51 }
 0x1eb   :  { %3561 = vmatprep.subr.bf16.mxu1 %v4048_v31  ;;  %3581 = vmatpush3.bf16.msra.mxu0 %v4059_v52 }
 0x1ec   :  { %3582 = vmatprep.subr.bf16.mxu0 %v4060_v53 }
 0x1ed   :  { %v2227_v57 = vpop.f32.mrf.mxu1 }
 0x1ee   :  { %v4463_v59 = vpop.f32.mrf.mxu0  ;;  %3562 = vmatpush3.bf16.msra.mxu1 %v4049_v54  ;;  %v2228_v6 = vadd.f32 %v2227_v57, %v4430_v58  ;;  %v2690_v58 = vrot.slane %v4472_v38, %v144_v46  ;;  %v4085_v46 = vld [vmem:[#allocation13 + $0x120] sm:$0xff]  }
 0x1ef   :  { %v2229_v61 = vpop.f32.mrf.mxu1  ;;  %3563 = vmatprep.subr.bf16.mxu1 %v4050_v55  ;;  %3583 = vmatpush3.bf16.msra.mxu0 %v4061_v0 }
 0x1f0   :  { %v2270_v62 = vpop.f32.mrf.mxu0  ;;  %3584 = vmatprep.subr.bf16.mxu0 %v4062_v56  ;;  %v2230_v33 = vadd.f32 %v2229_v61, %v4432_v63  ;;  %v2269_v34 = vadd.f32 %v4463_v59, %v2228_v6  ;;  %v4084_v56 = vld [vmem:[#allocation13 + $0x128] ss:$0 sps:$4 sm:$0xff]  }
 0x1f1   :  { %v2231_v10 = vpop.f32.mrf.mxu1 }
 0x1f2   :  { %v2272_v3 = vpop.f32.mrf.mxu0  ;;  %3564 = vmatpush3.bf16.msra.mxu1 %v4051_v60  ;;  %v2271_v36 = vadd.f32 %v2270_v62, %v2230_v33  ;;  %v3035_v62 = vsel %vm231_vm0, %v4084_v56, 0  ;;  %v4088_v10 = vld [vmem:[#allocation13 + $0x108] sm:$0xff]  }
 0x1f3   :  { %v2232_v4 = vpop.f32.mrf.mxu1  ;;  %3585 = vmatpush3.bf16.msra.mxu0 %v4063_v1  ;;  %3596 = vmatprep.subr.bf16.mxu1 %v4068_v9  ;;  %v4086_v9 = vld [vmem:[#allocation13 + $0x118] sm:$0xff]   ;;  %v4089_v3 = vld [vmem:[#allocation13 + $0x100] sm:$0xff]  }
 0x1f4   :  { %v2273_v5 = vpop.f32.mrf.mxu0  ;;  %3586 = vmatprep.subr.bf16.mxu0 %v4064_v2  ;;  %v4087_v2 = vld [vmem:[#allocation13 + $0x110] sm:$0xff]  }
 0x1f5   :  { %2634 = vmatmul.mubr.bf16.vlgmr.msra.gmra.mxu1 %v4441_v11  ;;  %v4075_v11 = vld [vmem:[#allocation13 + $0xa0] sm:$0xff]  }
 0x1f6   :  { %v2350_v14 = vpop.f32.mrf.mxu0  ;;  %3597 = vmatpush3.bf16.msra.mxu1 %v4069_v45 }
 0x1f7   :  { %3587 = vmatpush3.bf16.msra.mxu0 %v4065_v7  ;;  %3598 = vmatprep.subr.bf16.mxu1 %v4070_v20 }
 0x1f8   :  { %v2352_v16 = vpop.f32.mrf.mxu0  ;;  %3588 = vmatprep.subr.bf16.mxu0 %v4066_v12 }
 0x1fa   :  { %v2354_v21 = vpop.f32.mrf.mxu0  ;;  %3599 = vmatpush3.bf16.msra.mxu1 %v4071_v15 }
 0x1fb   :  { %3589 = vmatpush3.bf16.msra.mxu0 %v4067_v17  ;;  %3600 = vmatprep.subr.bf16.mxu1 %v4072_v18  ;;  %v2694_v21 = vrot.slane %v4472_v38, %v148_v44 }
 0x1fc   :  { %v2355_v23 = vpop.f32.mrf.mxu0  ;;  %3647 = vmatprep.subr.bf16.mxu0 %v4274_v19 }
 0x1fe   :  { %3601 = vmatpush3.bf16.msra.mxu1 %v4073_v22 }
 0x1ff   :  { %3602 = vmatprep.subr.bf16.mxu1 %v4074_v24 }
 0x202   :  { %3603 = vmatpush3.bf16.msra.mxu1 %v4075_v11 }
 0x203   :  { %3604 = vmatprep.subr.bf16.mxu1 %v4076_v25 }
 0x206   :  { %3605 = vmatpush3.bf16.msra.mxu1 %v4077_v26 }
 0x207   :  { %3606 = vmatprep.subr.bf16.mxu1 %v4078_v27 }
 0x20a   :  { %3607 = vmatpush3.bf16.msra.mxu1 %v4079_v28 }
 0x20b   :  { %3608 = vmatprep.subr.bf16.mxu1 %v4080_v29 }
 0x20e   :  { %3609 = vmatpush3.bf16.msra.mxu1 %v4081_v30 }
 0x20f   :  { %3610 = vmatprep.subr.bf16.mxu1 %v4082_v32 }
 0x212   :  { %3611 = vmatpush3.bf16.msra.mxu1 %v4083_v13 }
 0x22d   :  { %v2309_v35 = vpop.f32.mrf.mxu1 }
 0x22e   :  { %v2310_v37 = vadd.f32 %v2309_v35, %v2269_v34 }
 0x22f   :  { %v2311_v48 = vpop.f32.mrf.mxu1 }
 0x230   :  { %v2351_v50 = vadd.f32 %v2350_v14, %v2310_v37  ;;  %v2312_v51 = vadd.f32 %v2311_v48, %v2271_v36 }
 0x231   :  { %v2313_v63 = vpop.f32.mrf.mxu1 }
 0x232   :  { %v2708_v31 = vadd.f32 %v2686_v40, %v2351_v50  ;;  %v2353_v52 = vadd.f32 %v2352_v16, %v2312_v51 }
 0x233   :  { %v2314_v53 = vpop.f32.mrf.mxu1 }
 0x234   :  { %v2709_v54 = vadd.f32 %v2690_v58, %v2353_v52  ;;  %v2713_v55 = vmax.f32 %v2708_v31, 0.0 }
 0x236   :  { %v2391_v0 = vpop.f32.mrf.mxu0  ;;  %v2714_v57 = vmax.f32 %v2709_v54, 0.0  ;;  %v2718_v61 = vpack.c.bf16 %v2713_v55, %v2713_v55 }
 0x237   :  { %v2392_v7 = vadd.f32 %v2391_v0, %v4422_v39  ;;  %v2698_v39 = vrot.slane %v4472_v38, %v152_v47 }
 0x238   :  { %v2393_v59 = vpop.f32.mrf.mxu0  ;;  %v2719_v60 = vpack.c.bf16 %v2714_v57, %v2714_v57  ;;  %v2702_v57 = vrot.slane %v4472_v38, %v156_v49 }
 0x239   :  { %v2394_v12 = vadd.f32 %v2393_v59, %v4427_v41 }
 0x23a   :  { %v2395_v43 = vpop.f32.mrf.mxu0  ;;  %3069 = vmatprep.mubr.bf16.mxu0 %v2719_v60 }
 0x23b   :  { %3070 = vmatmul.mubr.bf16.vlgmr.msra.gmra.mxu0 %v2718_v61 }
 0x23c   :  { %v2396_v1 = vpop.f32.mrf.mxu0  ;;  %3648 = vmatpush3.bf16.msra.mxu0 %v3035_v62  ;;  %3659 = vmatprep.mubr.msk.bf16.mxu0 %vm4275_vm2, %v4274_v19 }
 0x23d   :  { %3649 = vmatprep.subr.bf16.mxu0 %v4274_v19 }
 0x240   :  { %3650 = vmatpush3.bf16.msra.mxu0 %v4085_v46 }
 0x241   :  { %3651 = vmatprep.subr.bf16.mxu0 %v4274_v19 }
 0x244   :  { %3652 = vmatpush3.bf16.msra.mxu0 %v4086_v9 }
 0x245   :  { %3653 = vmatprep.subr.bf16.mxu0 %v4274_v19 }
 0x248   :  { %3654 = vmatpush3.bf16.msra.mxu0 %v4087_v2 }
 0x249   :  { %3655 = vmatprep.subr.bf16.mxu0 %v4274_v19 }
 0x24c   :  { %3656 = vmatpush3.bf16.msra.mxu0 %v4088_v10 }
 0x24d   :  { %3657 = vmatprep.subr.bf16.mxu0 %v4274_v19 }
 0x250   :  { %3658 = vmatpush3.bf16.msra.mxu0 %v4089_v3 }
 0x26d   :  { %v2432_v45 = vpop.f32.mrf.mxu1 }
 0x26e   :  { %v2433_v14 = vadd.f32 %v2432_v45, %v2392_v7 }
 0x26f   :  { %v2434_v4 = vpop.f32.mrf.mxu1 }
 0x270   :  { %v2435_v17 = vadd.f32 %v2434_v4, %v2394_v12 }
 0x271   :  { %v2436_v5 = vpop.f32.mrf.mxu1 }
 0x273   :  { %v2437_v20 = vpop.f32.mrf.mxu1 }
 0x275   :  { %v2514_v16 = vpop.f32.mrf.mxu1 }
 0x276   :  { %v2473_v15 = vpop.f32.mrf.mxu0 }
 0x277   :  { %v2474_v18 = vadd.f32 %v2473_v15, %v2433_v14  ;;  %v2516_v19 = vpop.f32.mrf.mxu1 }
 0x278   :  { %v2475_v22 = vpop.f32.mrf.mxu0 }
 0x279   :  { %v2515_v23 = vadd.f32 %v2514_v16, %v2474_v18  ;;  %v2476_v24 = vadd.f32 %v2475_v22, %v2435_v17  ;;  %v2518_v25 = vpop.f32.mrf.mxu1 }
 0x27a   :  { %v2477_v11 = vpop.f32.mrf.mxu0 }
 0x27b   :  { %v2710_v41 = vadd.f32 %v2694_v21, %v2515_v23  ;;  %v2517_v26 = vadd.f32 %v2516_v19, %v2476_v24  ;;  %v2519_v28 = vpop.f32.mrf.mxu1 }
 0x27c   :  { %v2478_v27 = vpop.f32.mrf.mxu0 }
 0x27d   :  { %v2711_v29 = vadd.f32 %v2698_v39, %v2517_v26  ;;  %v2715_v30 = vmax.f32 %v2710_v41, 0.0 }
 0x27f   :  { %v2716_v32 = vmax.f32 %v2711_v29, 0.0  ;;  %v2720_v6 = vpack.c.bf16 %v2715_v30, %v2715_v30 }
 0x281   :  { %v2721_v13 = vpack.c.bf16 %v2716_v32, %v2716_v32 }
 0x283   :  { %3109 = vmatprep.mubr.bf16.mxu1 %v2721_v13 }
 0x284   :  { %3110 = vmatmul.mubr.bf16.vlgmr.msra.gmra.mxu1 %v2720_v6 }
 0x295   :  { %v3521_v44 = vpop.f32.mrf.mxu1 }
 0x296   :  { %v3543_v33 = vpop.f32.mrf.mxu0 }
 0x297   :  { %v3522_v34 = vpop.f32.mrf.mxu1 }
 0x298   :  { %v3544_v35 = vpop.f32.mrf.mxu0  ;;  %v3523_v63 = vadd.f32 %v3522_v34, %v3521_v44 }
 0x299   :  { %v3524_v36 = vpop.f32.mrf.mxu1  ;;  %v3545_v53 = vadd.f32 %v3544_v35, %v3543_v33 }
 0x29a   :  { %v3546_v37 = vpop.f32.mrf.mxu0  ;;  %v2556_v31 = vadd.f32 %v3523_v63, %v4434_v8 }
 0x29b   :  { %v3525_v47 = vpop.f32.mrf.mxu1 }
 0x29c   :  { %v3547_v40 = vpop.f32.mrf.mxu0  ;;  %v2596_v55 = vadd.f32 %v3545_v53, %v2556_v31 }
 0x29e   :  { %v2675_v48 = vpop.f32.mrf.mxu0 }
 0x2a0   :  { %v3645_v50 = vpop.f32.mrf.mxu0 }
 0x2a2   :  { %v2678_v51 = vpop.f32.mrf.mxu0 }
 0x2a4   :  { %v3646_v58 = vpop.f32.mrf.mxu0 }
 0x2b5   :  { %v3565_v52 = vpop.f32.mrf.mxu1 }
 0x2b7   :  { %v3566_v54 = vpop.f32.mrf.mxu1 }
 0x2b8   :  { %v3567_v0 = vadd.f32 %v3566_v54, %v3565_v52 }
 0x2b9   :  { %v3568_v56 = vpop.f32.mrf.mxu1 }
 0x2ba   :  { %v2636_v59 = vadd.f32 %v3567_v0, %v2596_v55 }
 0x2bb   :  { %v3569_v60 = vpop.f32.mrf.mxu1 }
 0x2bc   :  { %v2676_v61 = vadd.f32 %v2675_v48, %v2636_v59 }
 0x2be   :  { %v2712_v43 = vadd.f32 %v2702_v57, %v2676_v61 }
 0x2c0   :  { %v2717_v62 = vmax.f32 %v2712_v43, 0.0 }
 0x2c2   :  { %v2722_v1 = vpack.c.bf16 %v2717_v62, %v2717_v62 }
 0x2c4   :  { %3660 = vmatmul.mubr.msk.bf16.vlgmr.msra.gmra.mxu0 %vm3030_vm6, %v2722_v1 }
 0x2fb   :  { %v3590_v46 = vpop.f32.mrf.mxu0 }
 0x2fd   :  { %v3591_v8 = vpop.f32.mrf.mxu0 }
 0x2fe   :  { %v3592_v9 = vadd.f32 %v3591_v8, %v3590_v46 }
 0x2ff   :  { %v3593_v2 = vpop.f32.mrf.mxu0 }
 0x300   :  { %v3072_v38 = vadd.f32 %v3592_v9, %v3460_v42 }
 0x301   :  { %v3594_v10 = vpop.f32.mrf.mxu0 }
 0x344   :  { %v3612_v3 = vpop.f32.mrf.mxu1 }
 0x346   :  { %v3613_v45 = vpop.f32.mrf.mxu1 }
 0x347   :  { %v3614_v49 = vadd.f32 %v3613_v45, %v3612_v3 }
 0x348   :  { %v3615_v4 = vpop.f32.mrf.mxu1 }
 0x349   :  { %v3112_v7 = vadd.f32 %v3614_v49, %v3072_v38 }
 0x34a   :  { %v3616_v5 = vpop.f32.mrf.mxu1 }
 0x384   :  { %v3151_v20 = vpop.f32.mrf.mxu0 }
 0x385   :  { %v3152_v12 = vadd.f32 %v3151_v20, %v3112_v7 }
 0x386   :  { %v3661_v14 = vpop.f32.mrf.mxu0 }
 0x387   :  { %3157 = vst [vmem:[#allocation14] sm:$0xff] %v3152_v12 }
 0x388   :  { %v3154_v15 = vpop.f32.mrf.mxu0 }
 0x389   :  { %4241 = shalt.err (!%p4238_p11)
}
 0x38a   :  { %3167 = dma.vmem_to_hbm [thread:$0]  %s3165_s26, 128, %s4516_s9, [#allocation4]   ;;  %v3662_v16 = vpop.f32.mrf.mxu0 }
 0x38b   :  { %4258 = dma.done.wait [#allocation4], 128  }
 0x38c   :  { %4259 = vsyncadd [#allocation4], 4294967168 }
 0x38d   :  { %3171 = vsyncpa [#allocation3], 1 }
 0x38e   :  { %3172 = vsyncpa [#allocation6], 1 }
 0x38f   :  { %3173 = vsyncpa [#allocation9], 1 }
 0x390   :  { %3174 = vsyncpa [#allocation12], 1 }
 0x391   :  { %3175 = vsyncpa [#allocation4], 1 }

</bundles_post_ra>
